<compile_context>
chip_gen: v5e
topology: v5e:2x2
jax: 0.10.0
libtpu: 0.0.40
codegen_flags: <defaults>
</compile_context>

<pallas_src>
import functools

import jax
import jax.numpy as jnp
from jax import lax
from jax.experimental import pallas as pl
from jax.experimental.pallas import tpu as pltpu


def _round_up(x, m):
    return ((x + m - 1) // m) * m


def _aspp_kernel(rates_ref, x_ref, w_ref, b_ref, o_ref, acc_ref, *,
                 th, Wp, P, compute_dtype):
    # rates_ref: SMEM (R,) int32          dilation rate of the current group g
    # x_ref:     VMEM (Lp, Cin) f32       flat padded NHWC slab of batch n
    # w_ref:     VMEM (9, Cin, Cout_p)    3x3 taps of rate group g (bf16)
    # b_ref:     VMEM (1, Cout_p) f32     summed bias (over all rates)
    # o_ref:     VMEM (th*Wp, Cout_p)     padded-width output tile
    # acc_ref:   VMEM (th*Wp, Cout_p) f32 accumulator (lives across g steps)
    g = pl.program_id(2)
    rows, cpad = o_ref.shape
    h0 = pl.program_id(1) * th
    r = rates_ref[g]

    @pl.when(g == 0)
    def _init():
        # Fold the (summed) bias into the accumulator init.
        acc_ref[...] = jnp.broadcast_to(
            b_ref[...].astype(jnp.float32), (rows, cpad))

    # Flat offset of the (kh=1, kw=1) center tap for this row tile.
    base = P + (h0 + P) * Wp
    acc = acc_ref[...]
    for k in range(9):                       # unrolled 3x3 taps
        kh, kw = k // 3, k % 3
        start = base + ((kh - 1) * Wp + (kw - 1)) * r
        xs = x_ref[pl.ds(start, rows), :].astype(compute_dtype)
        acc = acc + jnp.dot(xs, w_ref[k], preferred_element_type=jnp.float32)
    acc_ref[...] = acc

    @pl.when(g == pl.num_programs(2) - 1)
    def _finalize():
        o_ref[...] = acc.astype(o_ref.dtype)


def aspp_forward(x_nchw, weights, biases, rates, *, row_tile=8,
                 compute_dtype=jnp.bfloat16):
    """ASPP forward: sum_r [ conv2d(x, W_r, dilation=r, padding=r) + b_r ].

    x_nchw:  (N, Cin, H, W)        PyTorch NCHW layout
    weights: (R, Cout, Cin, 3, 3)  PyTorch OIHW layout, one conv per rate
    biases:  (R, Cout)
    """
    N, Cin, H, W = x_nchw.shape
    R, Cout = weights.shape[0], weights.shape[1]
    assert R == len(rates) and weights.shape[2:] == (Cin, 3, 3)

    P = int(max(rates))
    th = max(8, _round_up(int(row_tile), 8))     # keep th*Wp a sublane multiple
    Ht = _round_up(H, th)                        # padded row count (no assert)
    Hp, Wp = Ht + 2 * P, W + 2 * P
    Lp = Hp * Wp + 2 * P
    Cout_p = max(128, _round_up(Cout, 128))      # lane-dense output
    rows = th * Wp

    # TODO(synk): if the surrounding model is NHWC, drop this transpose (and the
    # final one) to save two full HBM round-trips of the activation.
    x_nhwc = jnp.transpose(x_nchw, (0, 2, 3, 1))
    xp = jnp.pad(x_nhwc, ((0, 0), (P, P + Ht - H), (P, P), (0, 0)))
    # Flatten (h, w) into one axis with P extra zeros front/back so every
    # shifted tap window of a row tile stays in bounds.
    x_flat = jnp.pad(xp.reshape(N, Hp * Wp, Cin), ((0, 0), (P, P), (0, 0)))
    # TODO(synk): for very large feature maps (Cin>=1024, H,W>=65) replace the
    # per-batch resident slab with a halo'd row-tile manual DMA to bound VMEM.

    # (R, Cout, Cin, 3, 3) -> (R, 3, 3, Cin, Cout) -> (R, 9, Cin, Cout_p), bf16.
    w_taps = jnp.transpose(weights, (0, 3, 4, 2, 1)).reshape(R, 9, Cin, Cout)
    w_taps = jnp.pad(w_taps, ((0, 0), (0, 0), (0, 0), (0, Cout_p - Cout)))
    w_taps = w_taps.astype(compute_dtype)
    # sum_r (conv_r + b_r) == sum_r conv_r + sum_r b_r  (folded into acc init).
    btot = jnp.pad(jnp.sum(biases, axis=0).astype(jnp.float32),
                   (0, Cout_p - Cout)).reshape(1, Cout_p)
    rates_arr = jnp.asarray(rates, dtype=jnp.int32)

    grid = (N, Ht // th, R)
    kernel = functools.partial(_aspp_kernel, th=th, Wp=Wp, P=P,
                               compute_dtype=compute_dtype)

    # Rough VMEM budget (double-buffered ins/outs + scratch), capped so it is
    # safe on v7x (64 MiB physical) while leaving the v5e/v6e default behind.
    out_itemsize = jnp.dtype(x_nchw.dtype).itemsize
    est = (2 * Lp * Cin * 4 + 2 * 9 * Cin * Cout_p * 2
           + 2 * rows * Cout_p * out_itemsize + rows * Cout_p * 4 + 2 * Cout_p * 4)
    vmem_limit = int(min(max(32 * 2 ** 20, 2 * est), 48 * 2 ** 20))

    flops = 2 * N * (Ht // th) * R * 9 * rows * Cin * Cout_p
    bytes_accessed = (x_flat.size * 4
                      + w_taps.size * 2 * N * (Ht // th)   # weights re-streamed
                      + btot.size * 4
                      + N * Ht * Wp * Cout_p * out_itemsize)

    out_flat = pl.pallas_call(
        kernel,
        out_shape=jax.ShapeDtypeStruct((N, Ht * Wp, Cout_p), x_nchw.dtype),
        grid_spec=pltpu.PrefetchScalarGridSpec(
            num_scalar_prefetch=1,
            grid=grid,
            in_specs=[
                pl.BlockSpec((None, Lp, Cin),
                             lambda n, hb, g, rr: (n, 0, 0)),
                pl.BlockSpec((None, 9, Cin, Cout_p),
                             lambda n, hb, g, rr: (g, 0, 0, 0)),
                pl.BlockSpec((1, Cout_p),
                             lambda n, hb, g, rr: (0, 0)),
            ],
            out_specs=pl.BlockSpec((None, rows, Cout_p),
                                   lambda n, hb, g, rr: (n, hb, 0)),
            scratch_shapes=[pltpu.VMEM((rows, Cout_p), jnp.float32)],
        ),
        compiler_params=pltpu.CompilerParams(
            dimension_semantics=("parallel", "parallel", "arbitrary"),
            vmem_limit_bytes=vmem_limit),
        cost_estimate=pl.CostEstimate(flops=flops, transcendentals=0,
                                      bytes_accessed=bytes_accessed),
    )(rates_arr, x_flat, w_taps, btot)

    # Strip width padding, extra rows and Cout padding; back to NCHW.
    out = out_flat.reshape(N, Ht, Wp, Cout_p)[:, :H, P:P + W, :Cout]
    return jnp.transpose(out, (0, 3, 1, 2))


def aspp_reference(x_nchw, weights, biases, rates):
    """Pure-JAX f32 reference matching the PyTorch module exactly."""
    outs = []
    for i, r in enumerate(rates):
        o = lax.conv_general_dilated(
            x_nchw, weights[i], window_strides=(1, 1),
            padding=[(r, r), (r, r)], rhs_dilation=(r, r),
            dimension_numbers=("NCHW", "OIHW", "NCHW"))
        outs.append(o + biases[i][None, :, None, None])
    return functools.reduce(lambda a, b: a + b, outs)


if __name__ == "__main__":
    key = jax.random.PRNGKey(0)
    N, Cin, H, W = 2, 4, 16, 16
    Cout = 8
    rates = (1, 2, 4)

    kx, kw = jax.random.split(key)
    x = jax.random.normal(kx, (N, Cin, H, W), dtype=jnp.float32)
    # nn.init.normal_(weight, mean=0, std=0.01); nn.init.constant_(bias, 0)
    weights = 0.01 * jax.random.normal(
        kw, (len(rates), Cout, Cin, 3, 3), dtype=jnp.float32)
    biases = jnp.zeros((len(rates), Cout), dtype=jnp.float32)

    out = aspp_forward(x, weights, biases, rates)
    out = jax.block_until_ready(out)

    ref = aspp_reference(x, weights, biases, rates)
    assert out.shape == (N, Cout, H, W)
    # bf16 MXU inputs with f32 accumulation -> bf16-appropriate tolerance.
    assert bool(jnp.allclose(out, ref, atol=5e-3, rtol=5e-2)), "mismatch vs reference"
    print("KERNEL_OK")
</pallas_src>

<mosaic_0001>
module attributes {stable_mosaic.version = 11 : i64} {
  func.func @_aspp_kernel(%arg0: i32, %arg1: i32, %arg2: i32, %arg3: memref<3xi32, #tpu.memory_space<smem>>, %arg4: memref<1x584x4xf32, #tpu.memory_space<vmem>>, %arg5: memref<1x9x4x128xbf16, #tpu.memory_space<vmem>>, %arg6: memref<1x128xf32, #tpu.memory_space<vmem>>, %arg7: memref<1x192x128xf32, #tpu.memory_space<vmem>>, %arg8: memref<192x128xf32, #tpu.memory_space<vmem>>) attributes {dimension_semantics = [#tpu.dimension_semantics<parallel>, #tpu.dimension_semantics<parallel>, #tpu.dimension_semantics<arbitrary>], iteration_bounds = array<i64: 2, 2, 3>, scalar_prefetch = 1 : i64, scratch_operands = 1 : i64, tpu.core_type = #tpu.core_type<tc>, window_params = [{transform_indices = @transform_0, window_bounds = array<i64: 1, 584, 4>}, {transform_indices = @transform_1, window_bounds = array<i64: 1, 9, 4, 128>}, {pipeline_mode = #tpu.pipeline_mode<synchronous>, transform_indices = @transform_2, window_bounds = array<i64: 1, 128>}, {transform_indices = @transform_3, window_bounds = array<i64: 1, 192, 128>}]} {
    %c8_i32 = arith.constant 8 : i32
    %0 = arith.muli %arg1, %c8_i32 : i32
    %1 = arith.index_cast %arg2 : i32 to index
    %2 = memref.load %arg3[%1] : memref<3xi32, #tpu.memory_space<smem>>
    %c0_i32 = arith.constant 0 : i32
    %3 = arith.cmpi eq, %arg2, %c0_i32 : i32
    %4 = arith.extui %3 : i1 to i32
    %c0_i32_0 = arith.constant 0 : i32
    %5 = arith.cmpi ne, %4, %c0_i32_0 : i32
    scf.if %5 {
      %c0_62 = arith.constant 0 : index
      %c0_63 = arith.constant 0 : index
      %104 = vector.load %arg6[%c0_62, %c0_63] : memref<1x128xf32, #tpu.memory_space<vmem>>, vector<1x128xf32>
      %105 = vector.shape_cast %104 : vector<1x128xf32> to vector<1x128xf32>
      %106 = vector.broadcast %105 : vector<1x128xf32> to vector<192x128xf32>
      %c0_64 = arith.constant 0 : index
      %c0_65 = arith.constant 0 : index
      %107 = vector.load %arg8[%c0_64, %c0_65] : memref<192x128xf32, #tpu.memory_space<vmem>>, vector<192x128xf32>
      tpu.vector_store %arg8[%c0_64, %c0_65], %106 {strides = array<i32>} : memref<192x128xf32, #tpu.memory_space<vmem>>, vector<192x128xf32>,
    } else {
    }
    %c4_i32 = arith.constant 4 : i32
    %6 = arith.addi %0, %c4_i32 : i32
    %c24_i32 = arith.constant 24 : i32
    %7 = arith.muli %6, %c24_i32 : i32
    %c4_i32_1 = arith.constant 4 : i32
    %8 = arith.addi %c4_i32_1, %7 : i32
    %c0 = arith.constant 0 : index
    %c0_2 = arith.constant 0 : index
    %9 = vector.load %arg8[%c0, %c0_2] : memref<192x128xf32, #tpu.memory_space<vmem>>, vector<192x128xf32>
    %c-25_i32 = arith.constant -25 : i32
    %10 = arith.muli %c-25_i32, %2 : i32
    %11 = arith.addi %8, %10 : i32
    %c0_3 = arith.constant 0 : index
    %12 = arith.index_cast %11 : i32 to index
    %c0_4 = arith.constant 0 : index
    %13 = vector.load %arg4[%c0_3, %12, %c0_4] : memref<1x584x4xf32, #tpu.memory_space<vmem>>, vector<1x192x4xf32>
    %14 = vector.shape_cast %13 : vector<1x192x4xf32> to vector<192x4xf32>
    %15 = arith.truncf %14 : vector<192x4xf32> to vector<192x4xbf16>
    %c0_5 = arith.constant 0 : index
    %c0_6 = arith.constant 0 : index
    %c0_7 = arith.constant 0 : index
    %c0_8 = arith.constant 0 : index
    %16 = vector.load %arg5[%c0_5, %c0_6, %c0_7, %c0_8] : memref<1x9x4x128xbf16, #tpu.memory_space<vmem>>, vector<1x1x4x128xbf16>
    %17 = vector.shape_cast %16 : vector<1x1x4x128xbf16> to vector<4x128xbf16>
    %cst = arith.constant dense<0.000000e+00> : vector<192x128xf32>
    %18 = tpu.matmul %15, %17, %cst {dimension_numbers = #tpu.dot_dimension_numbers<[1], [0], [0], [1], [0, 0, 1, 1], [], []>} : vector<192x4xbf16>, vector<4x128xbf16>, vector<192x128xf32> -> vector<192x128xf32>
    %19 = arith.addf %9, %18 : vector<192x128xf32>
    %c-24_i32 = arith.constant -24 : i32
    %20 = arith.muli %c-24_i32, %2 : i32
    %21 = arith.addi %8, %20 : i32
    %c0_9 = arith.constant 0 : index
    %22 = arith.index_cast %21 : i32 to index
    %c0_10 = arith.constant 0 : index
    %23 = vector.load %arg4[%c0_9, %22, %c0_10] : memref<1x584x4xf32, #tpu.memory_space<vmem>>, vector<1x192x4xf32>
    %24 = vector.shape_cast %23 : vector<1x192x4xf32> to vector<192x4xf32>
    %25 = arith.truncf %24 : vector<192x4xf32> to vector<192x4xbf16>
    %c0_11 = arith.constant 0 : index
    %c1 = arith.constant 1 : index
    %c0_12 = arith.constant 0 : index
    %c0_13 = arith.constant 0 : index
    %26 = vector.load %arg5[%c0_11, %c1, %c0_12, %c0_13] : memref<1x9x4x128xbf16, #tpu.memory_space<vmem>>, vector<1x1x4x128xbf16>
    %27 = vector.shape_cast %26 : vector<1x1x4x128xbf16> to vector<4x128xbf16>
    %cst_14 = arith.constant dense<0.000000e+00> : vector<192x128xf32>
    %28 = tpu.matmul %25, %27, %cst_14 {dimension_numbers = #tpu.dot_dimension_numbers<[1], [0], [0], [1], [0, 0, 1, 1], [], []>} : vector<192x4xbf16>, vector<4x128xbf16>, vector<192x128xf32> -> vector<192x128xf32>
    %29 = arith.addf %19, %28 : vector<192x128xf32>
    %c-23_i32 = arith.constant -23 : i32
    %30 = arith.muli %c-23_i32, %2 : i32
    %31 = arith.addi %8, %30 : i32
    %c0_15 = arith.constant 0 : index
    %32 = arith.index_cast %31 : i32 to index
    %c0_16 = arith.constant 0 : index
    %33 = vector.load %arg4[%c0_15, %32, %c0_16] : memref<1x584x4xf32, #tpu.memory_space<vmem>>, vector<1x192x4xf32>
    %34 = vector.shape_cast %33 : vector<1x192x4xf32> to vector<192x4xf32>
    %35 = arith.truncf %34 : vector<192x4xf32> to vector<192x4xbf16>
    %c0_17 = arith.constant 0 : index
    %c2 = arith.constant 2 : index
    %c0_18 = arith.constant 0 : index
    %c0_19 = arith.constant 0 : index
    %36 = vector.load %arg5[%c0_17, %c2, %c0_18, %c0_19] : memref<1x9x4x128xbf16, #tpu.memory_space<vmem>>, vector<1x1x4x128xbf16>
    %37 = vector.shape_cast %36 : vector<1x1x4x128xbf16> to vector<4x128xbf16>
    %cst_20 = arith.constant dense<0.000000e+00> : vector<192x128xf32>
    %38 = tpu.matmul %35, %37, %cst_20 {dimension_numbers = #tpu.dot_dimension_numbers<[1], [0], [0], [1], [0, 0, 1, 1], [], []>} : vector<192x4xbf16>, vector<4x128xbf16>, vector<192x128xf32> -> vector<192x128xf32>
    %39 = arith.addf %29, %38 : vector<192x128xf32>
    %c-1_i32 = arith.constant -1 : i32
    %40 = arith.muli %c-1_i32, %2 : i32
    %41 = arith.addi %8, %40 : i32
    %c0_21 = arith.constant 0 : index
    %42 = arith.index_cast %41 : i32 to index
    %c0_22 = arith.constant 0 : index
    %43 = vector.load %arg4[%c0_21, %42, %c0_22] : memref<1x584x4xf32, #tpu.memory_space<vmem>>, vector<1x192x4xf32>
    %44 = vector.shape_cast %43 : vector<1x192x4xf32> to vector<192x4xf32>
    %45 = arith.truncf %44 : vector<192x4xf32> to vector<192x4xbf16>
    %c0_23 = arith.constant 0 : index
    %c3 = arith.constant 3 : index
    %c0_24 = arith.constant 0 : index
    %c0_25 = arith.constant 0 : index
    %46 = vector.load %arg5[%c0_23, %c3, %c0_24, %c0_25] : memref<1x9x4x128xbf16, #tpu.memory_space<vmem>>, vector<1x1x4x128xbf16>
    %47 = vector.shape_cast %46 : vector<1x1x4x128xbf16> to vector<4x128xbf16>
    %cst_26 = arith.constant dense<0.000000e+00> : vector<192x128xf32>
    %48 = tpu.matmul %45, %47, %cst_26 {dimension_numbers = #tpu.dot_dimension_numbers<[1], [0], [0], [1], [0, 0, 1, 1], [], []>} : vector<192x4xbf16>, vector<4x128xbf16>, vector<192x128xf32> -> vector<192x128xf32>
    %49 = arith.addf %39, %48 : vector<192x128xf32>
    %c0_i32_27 = arith.constant 0 : i32
    %50 = arith.muli %c0_i32_27, %2 : i32
    %51 = arith.addi %8, %50 : i32
    %c0_28 = arith.constant 0 : index
    %52 = arith.index_cast %51 : i32 to index
    %c0_29 = arith.constant 0 : index
    %53 = vector.load %arg4[%c0_28, %52, %c0_29] : memref<1x584x4xf32, #tpu.memory_space<vmem>>, vector<1x192x4xf32>
    %54 = vector.shape_cast %53 : vector<1x192x4xf32> to vector<192x4xf32>
    %55 = arith.truncf %54 : vector<192x4xf32> to vector<192x4xbf16>
    %c0_30 = arith.constant 0 : index
    %c4 = arith.constant 4 : index
    %c0_31 = arith.constant 0 : index
    %c0_32 = arith.constant 0 : index
    %56 = vector.load %arg5[%c0_30, %c4, %c0_31, %c0_32] : memref<1x9x4x128xbf16, #tpu.memory_space<vmem>>, vector<1x1x4x128xbf16>
    %57 = vector.shape_cast %56 : vector<1x1x4x128xbf16> to vector<4x128xbf16>
    %cst_33 = arith.constant dense<0.000000e+00> : vector<192x128xf32>
    %58 = tpu.matmul %55, %57, %cst_33 {dimension_numbers = #tpu.dot_dimension_numbers<[1], [0], [0], [1], [0, 0, 1, 1], [], []>} : vector<192x4xbf16>, vector<4x128xbf16>, vector<192x128xf32> -> vector<192x128xf32>
    %59 = arith.addf %49, %58 : vector<192x128xf32>
    %c1_i32 = arith.constant 1 : i32
    %60 = arith.muli %c1_i32, %2 : i32
    %61 = arith.addi %8, %60 : i32
    %c0_34 = arith.constant 0 : index
    %62 = arith.index_cast %61 : i32 to index
    %c0_35 = arith.constant 0 : index
    %63 = vector.load %arg4[%c0_34, %62, %c0_35] : memref<1x584x4xf32, #tpu.memory_space<vmem>>, vector<1x192x4xf32>
    %64 = vector.shape_cast %63 : vector<1x192x4xf32> to vector<192x4xf32>
    %65 = arith.truncf %64 : vector<192x4xf32> to vector<192x4xbf16>
    %c0_36 = arith.constant 0 : index
    %c5 = arith.constant 5 : index
    %c0_37 = arith.constant 0 : index
    %c0_38 = arith.constant 0 : index
    %66 = vector.load %arg5[%c0_36, %c5, %c0_37, %c0_38] : memref<1x9x4x128xbf16, #tpu.memory_space<vmem>>, vector<1x1x4x128xbf16>
    %67 = vector.shape_cast %66 : vector<1x1x4x128xbf16> to vector<4x128xbf16>
    %cst_39 = arith.constant dense<0.000000e+00> : vector<192x128xf32>
    %68 = tpu.matmul %65, %67, %cst_39 {dimension_numbers = #tpu.dot_dimension_numbers<[1], [0], [0], [1], [0, 0, 1, 1], [], []>} : vector<192x4xbf16>, vector<4x128xbf16>, vector<192x128xf32> -> vector<192x128xf32>
    %69 = arith.addf %59, %68 : vector<192x128xf32>
    %c23_i32 = arith.constant 23 : i32
    %70 = arith.muli %c23_i32, %2 : i32
    %71 = arith.addi %8, %70 : i32
    %c0_40 = arith.constant 0 : index
    %72 = arith.index_cast %71 : i32 to index
    %c0_41 = arith.constant 0 : index
    %73 = vector.load %arg4[%c0_40, %72, %c0_41] : memref<1x584x4xf32, #tpu.memory_space<vmem>>, vector<1x192x4xf32>
    %74 = vector.shape_cast %73 : vector<1x192x4xf32> to vector<192x4xf32>
    %75 = arith.truncf %74 : vector<192x4xf32> to vector<192x4xbf16>
    %c0_42 = arith.constant 0 : index
    %c6 = arith.constant 6 : index
    %c0_43 = arith.constant 0 : index
    %c0_44 = arith.constant 0 : index
    %76 = vector.load %arg5[%c0_42, %c6, %c0_43, %c0_44] : memref<1x9x4x128xbf16, #tpu.memory_space<vmem>>, vector<1x1x4x128xbf16>
    %77 = vector.shape_cast %76 : vector<1x1x4x128xbf16> to vector<4x128xbf16>
    %cst_45 = arith.constant dense<0.000000e+00> : vector<192x128xf32>
    %78 = tpu.matmul %75, %77, %cst_45 {dimension_numbers = #tpu.dot_dimension_numbers<[1], [0], [0], [1], [0, 0, 1, 1], [], []>} : vector<192x4xbf16>, vector<4x128xbf16>, vector<192x128xf32> -> vector<192x128xf32>
    %79 = arith.addf %69, %78 : vector<192x128xf32>
    %c24_i32_46 = arith.constant 24 : i32
    %80 = arith.muli %c24_i32_46, %2 : i32
    %81 = arith.addi %8, %80 : i32
    %c0_47 = arith.constant 0 : index
    %82 = arith.index_cast %81 : i32 to index
    %c0_48 = arith.constant 0 : index
    %83 = vector.load %arg4[%c0_47, %82, %c0_48] : memref<1x584x4xf32, #tpu.memory_space<vmem>>, vector<1x192x4xf32>
    %84 = vector.shape_cast %83 : vector<1x192x4xf32> to vector<192x4xf32>
    %85 = arith.truncf %84 : vector<192x4xf32> to vector<192x4xbf16>
    %c0_49 = arith.constant 0 : index
    %c7 = arith.constant 7 : index
    %c0_50 = arith.constant 0 : index
    %c0_51 = arith.constant 0 : index
    %86 = vector.load %arg5[%c0_49, %c7, %c0_50, %c0_51] : memref<1x9x4x128xbf16, #tpu.memory_space<vmem>>, vector<1x1x4x128xbf16>
    %87 = vector.shape_cast %86 : vector<1x1x4x128xbf16> to vector<4x128xbf16>
    %cst_52 = arith.constant dense<0.000000e+00> : vector<192x128xf32>
    %88 = tpu.matmul %85, %87, %cst_52 {dimension_numbers = #tpu.dot_dimension_numbers<[1], [0], [0], [1], [0, 0, 1, 1], [], []>} : vector<192x4xbf16>, vector<4x128xbf16>, vector<192x128xf32> -> vector<192x128xf32>
    %89 = arith.addf %79, %88 : vector<192x128xf32>
    %c25_i32 = arith.constant 25 : i32
    %90 = arith.muli %c25_i32, %2 : i32
    %91 = arith.addi %8, %90 : i32
    %c0_53 = arith.constant 0 : index
    %92 = arith.index_cast %91 : i32 to index
    %c0_54 = arith.constant 0 : index
    %93 = vector.load %arg4[%c0_53, %92, %c0_54] : memref<1x584x4xf32, #tpu.memory_space<vmem>>, vector<1x192x4xf32>
    %94 = vector.shape_cast %93 : vector<1x192x4xf32> to vector<192x4xf32>
    %95 = arith.truncf %94 : vector<192x4xf32> to vector<192x4xbf16>
    %c0_55 = arith.constant 0 : index
    %c8 = arith.constant 8 : index
    %c0_56 = arith.constant 0 : index
    %c0_57 = arith.constant 0 : index
    %96 = vector.load %arg5[%c0_55, %c8, %c0_56, %c0_57] : memref<1x9x4x128xbf16, #tpu.memory_space<vmem>>, vector<1x1x4x128xbf16>
    %97 = vector.shape_cast %96 : vector<1x1x4x128xbf16> to vector<4x128xbf16>
    %cst_58 = arith.constant dense<0.000000e+00> : vector<192x128xf32>
    %98 = tpu.matmul %95, %97, %cst_58 {dimension_numbers = #tpu.dot_dimension_numbers<[1], [0], [0], [1], [0, 0, 1, 1], [], []>} : vector<192x4xbf16>, vector<4x128xbf16>, vector<192x128xf32> -> vector<192x128xf32>
    %99 = arith.addf %89, %98 : vector<192x128xf32>
    %c0_59 = arith.constant 0 : index
    %c0_60 = arith.constant 0 : index
    %100 = vector.load %arg8[%c0_59, %c0_60] : memref<192x128xf32, #tpu.memory_space<vmem>>, vector<192x128xf32>
    tpu.vector_store %arg8[%c0_59, %c0_60], %99 {strides = array<i32>} : memref<192x128xf32, #tpu.memory_space<vmem>>, vector<192x128xf32>,
    %c2_i32 = arith.constant 2 : i32
    %101 = arith.cmpi eq, %arg2, %c2_i32 : i32
    %102 = arith.extui %101 : i1 to i32
    %c0_i32_61 = arith.constant 0 : i32
    %103 = arith.cmpi ne, %102, %c0_i32_61 : i32
    scf.if %103 {
      %c0_62 = arith.constant 0 : index
      %c0_63 = arith.constant 0 : index
      %c0_64 = arith.constant 0 : index
      %104 = vector.load %arg7[%c0_62, %c0_63, %c0_64] : memref<1x192x128xf32, #tpu.memory_space<vmem>>, vector<1x192x128xf32>
      %105 = vector.shape_cast %104 : vector<1x192x128xf32> to vector<192x128xf32>
      %106 = vector.shape_cast %99 : vector<192x128xf32> to vector<1x192x128xf32>
      tpu.vector_store %arg7[%c0_62, %c0_63, %c0_64], %106 {strides = array<i32>} : memref<1x192x128xf32, #tpu.memory_space<vmem>>, vector<1x192x128xf32>,
    } else {
    }
    return
  }
  func.func @transform_0(%arg0: i32, %arg1: i32, %arg2: i32, %arg3: memref<3xi32, #tpu.memory_space<smem>>) -> (i32, i32, i32) {
    %c0_i32 = arith.constant 0 : i32
    %c0_i32_0 = arith.constant 0 : i32
    %c0_i32_1 = arith.constant 0 : i32
    return %arg0, %c0_i32, %c0_i32_0 : i32, i32, i32
  }
  func.func @transform_1(%arg0: i32, %arg1: i32, %arg2: i32, %arg3: memref<3xi32, #tpu.memory_space<smem>>) -> (i32, i32, i32, i32) {
    %c0_i32 = arith.constant 0 : i32
    %c0_i32_0 = arith.constant 0 : i32
    %c0_i32_1 = arith.constant 0 : i32
    %c0_i32_2 = arith.constant 0 : i32
    return %arg2, %c0_i32, %c0_i32_0, %c0_i32_1 : i32, i32, i32, i32
  }
  func.func @transform_2(%arg0: i32, %arg1: i32, %arg2: i32, %arg3: memref<3xi32, #tpu.memory_space<smem>>) -> (i32, i32) {
    %c0_i32 = arith.constant 0 : i32
    %c0_i32_0 = arith.constant 0 : i32
    %c0_i32_1 = arith.constant 0 : i32
    return %c0_i32, %c0_i32_0 : i32, i32
  }
  func.func @transform_3(%arg0: i32, %arg1: i32, %arg2: i32, %arg3: memref<3xi32, #tpu.memory_space<smem>>) -> (i32, i32, i32) {
    %c0_i32 = arith.constant 0 : i32
    %c0_i32_0 = arith.constant 0 : i32
    return %arg0, %arg1, %c0_i32 : i32, i32, i32
  }
}

</mosaic_0001>

<bundles_post_ra>
// kernel: tpu_custom_call.1
= control target key start
LH: loop header
LB: loop body
LE: loop exit
PB: predicated region body
PF: predicated region fallthrough
CT: control target
= control target key end

     0   :  { %s2607_s18 = smov [#allocation4]   ;;  %s3437_s0 = inlined_call_operand.vmem [shape: s32[3], index: 0, kind: input, shape index: {}]   ;;  %s3438_s1 = inlined_call_operand.vmem [shape: f32[2,584,4], index: 1, kind: input, shape index: {}]   ;;  %s3439_s2 = inlined_call_operand.vmem [shape: bf16[3,9,4,128], index: 2, kind: input, shape index: {}]   ;;  %s3440_s3 = inlined_call_operand.vmem [shape: f32[1,128], index: 3, kind: input, shape index: {}]   ;;  %s3441_s4 = inlined_call_operand.hbm [shape: f32[2,384,128], index: 4, kind: output, shape index: {}]  }
   0x1   :  { %s10_s17 = sshll.u32 %s3437_s0, 4  ;;  %s11_s17 = int_to_ptr.vmem [resolvable:$true] %s10_s17 }
   0x2   :  { %13 = dma.vmem_to_smem %s11_s17, 16, %s2607_s18, [#allocation3] }
   0x3   :  { %2561 = dma.done.wait [#allocation3], 16 }
   0x4   :  { %2562 = vsyncadd [#allocation3], 4294967280 }
   0x5   :  { %16 = sfence }
   0x6   :  { %17 = vsyncpa [#allocation6], 0 }
   0x7   :  { %19 = vsyncpa [#allocation6 + $0x1], 0  ;;  %s2638_s19 = smov 0   ;;  %s2640_s20 = smov 0  }
   0x8   :  { %s2642_s21 = smov 0   ;;  %s2644_s22 = smov 0  }
   0x9   :  { %s2646_s23 = smov 0   ;;  %s2648_s24 = smov 0  }
   0xa   :  { %s2650_s0 = smov 0   ;;  %s2652_s25 = smov 0  }
   0xb   :  { %s2654_s26 = smov 0   ;;  %s2656_s27 = smov 0  }
   0xc LB: > { %3446 = sst [smem:[#allocation9_spill]] %s2601_s26  ;;  %s2046_s28 = sadd.s32 4294967295, %s2605_s27   ;;  %s2605_s27 = sphi %s2656_s27, %s25_s27   ;;  %s2601_s26 = sphi %s2654_s26, %s3456_s26   ;;  %s2597_s25 = sphi %s2652_s25, %s3463_s25   ;;  %s2593_s0 = sphi %s2650_s0, %s3462_s0   ;;  %s2589_s24 = sphi %s2648_s24, %s3453_s24   ;;  %s2585_s23 = sphi %s2646_s23, %s3461_s23   ;;  %s2581_s22 = sphi %s2644_s22, %s3460_s22   ;;  %s2577_s21 = sphi %s2642_s21, %s3459_s21   ;;  %s2573_s20 = sphi %s2640_s20, %s3458_s20   ;;  %s2569_s19 = sphi %s2638_s19, %s3457_s19  }
   0xd   : > { %s2047_s29 = sadd.s32 4294967294, %s2605_s27   ;;  %s37_s30 = sadd.s32 1, %s2593_s0 }
   0xe   : > { %p38_p0 = scmp.ge.s32.totalorder %s37_s30, 3  ;;  %s40_s5 = sadd.s32 1, %s2597_s25 }
   0xf   : > { %s44_s6 = sadd.s32 1, %s2601_s26  ;;  %p136_p1 = scmp.ne.s32.totalorder %s2577_s21, %s2573_s20 }
  0x10   : > { %s3465_s30 = smov (%p38_p0, %s37_s30), 0  ;;  %s3467_s5 = smov (!%p38_p0, %s40_s5), %s2597_s25 }
  0x11   : > { %3447 = sst [smem:[#allocation10_spill]] %s3465_s30  ;;  %p137_p2 = scmp.eq.s32.totalorder %s2046_s28, 11 }
  0x12   : > { %p142_p3 = scmp.ne.s32.totalorder %s2573_s20, %s2569_s19  ;;  %p42_p4 = scmp.ge.s32.totalorder %s3467_s5, 2 }
  0x13   : > { %p143_p5 = scmp.eq.s32.totalorder %s2047_s29, 11  ;;  %p2700_p6 = por %p137_p2, %p136_p1 }
  0x14   : > { %s3469_s5 = smov (%p42_p4, %s3467_s5), 0  ;;  %s3471_s6 = smov (!%p42_p4, %s44_s6), %s2601_s26 }
  0x15   : > { %3449 = sst [smem:[#allocation11_spill]] %s3469_s5  ;;  %p2707_p7 = por %p143_p5, %p142_p3 }
  0x16   : > { %p2050_p8 = scmp.ge.s32.totalorder %s2605_s27, 1  ;;  %p46_p9 = scmp.ge.s32.totalorder %s3471_s6, 2 }
  0x17   : > { %p180_p10 = scmp.lt.s32.totalorder %s2605_s27, 13  ;;  %s122_s9 = ssub.s32 %s2597_s25, %s3469_s5 }
  0x18   : > { %s3473_s6 = smov (%p46_p9, %s3471_s6), 0  ;;  %s126_s12 = sadd.s32 1, %s2577_s21 }
  0x19   : > { %3451 = sst [smem:[#allocation12_spill]] %s3473_s6  ;;  %p181_p11 = pnand %p2050_p8, %p180_p10 }
  0x1a   : > { %s121_s10 = ssub.s32 %s2601_s26, %s3473_s6  ;;  %s3445_s14 = sand.u32 (!%p181_p11), 1, %s2573_s20  }
  0x1b   : > { %s123_s11 = sor.u32 %s122_s9, %s121_s10  ;;  %184 = sbr.rel (%p181_p11) target bundleno = 683 (0x2ab), region = 32 }
  0x1c   : > { %p124_p12 = scmp.eq.s32.totalorder %s123_s11, 0  ;;  %p209_p13 = scmp.lt.s32.totalorder (!%p181_p11), %s2589_s24, 1 }
  0x1d   : > { %s2386_s15 = smul.u32 (!%p181_p11), 192, %s3445_s14  ;;  %p214_p0 = scmp.lt.s32.totalorder (!%p181_p11), %s2581_s22, 2 }
  0x1e   : > { %s2721_s13 = scalar_select %p124_p12, %s2577_s21, %s126_s12  }
  0x1f   : > { %s2053_s17 = sshll.u32 (!%p181_p11), %s2585_s23, 3  ;;  %s2731_s28 = sld [smem:[#allocation4 + %s2581_s22]] (!%p181_p11) }
  0x20   : > { %s210_s16 = scalar_select %p209_p13, %s2589_s24, 1 }
  0x21   : > { %s215_s29 = scalar_select %p214_p0, %s2581_s22, 2 }
  0x22   : > { %s2387_s18 = smul.u32 584, %s210_s16  ;;  %s2744_s26 = scalar_lea.vmem [#allocation5], %s2386_s15 }
  0x23   : > { %s2388_s12 = smul.u32 18, %s215_s29  ;;  %p2054_p1 = scmp.ne.s32.totalorder %s2581_s22, 0 }
  0x24   : > { %s2737_s11 = scalar_lea.vmem %s3438_s1, %s2387_s18 }
  0x25   : > { %s2742_s30 = scalar_lea.vmem %s3439_s2, %s2388_s12  ;;  %226 = sbr.rel (%p2054_p1) target bundleno = 67 (0x43), region = 36 }
  0x2a   : > { %v2480_v0 = vld [vmem:[%s3440_s3] ss:$0 sm:$0xff] }
  0x2b   : > { %231 = vst [vmem:[#allocation2 + $0xb0] sm:$0xff] %v2480_v0 }
  0x2c   : > { %232 = vst [vmem:[#allocation2] sm:$0xff] %v2480_v0 }
  0x2d   : > { %233 = vst [vmem:[#allocation2 + $0x10] sm:$0xff] %v2480_v0 }
  0x2e   : > { %234 = vst [vmem:[#allocation2 + $0x48] sm:$0xff] %v2480_v0 }
  0x2f   : > { %235 = vst [vmem:[#allocation2 + $0x60] sm:$0xff] %v2480_v0 }
  0x30   : > { %236 = vst [vmem:[#allocation2 + $0x28] sm:$0xff] %v2480_v0 }
  0x31   : > { %237 = vst [vmem:[#allocation2 + $0x40] sm:$0xff] %v2480_v0 }
  0x32   : > { %238 = vst [vmem:[#allocation2 + $0x78] sm:$0xff] %v2480_v0 }
  0x33   : > { %239 = vst [vmem:[#allocation2 + $0x88] sm:$0xff] %v2480_v0 }
  0x34   : > { %240 = vst [vmem:[#allocation2 + $0x90] sm:$0xff] %v2480_v0 }
  0x35   : > { %241 = vst [vmem:[#allocation2 + $0x18] sm:$0xff] %v2480_v0 }
  0x36   : > { %242 = vst [vmem:[#allocation2 + $0x98] sm:$0xff] %v2480_v0 }
  0x37   : > { %243 = vst [vmem:[#allocation2 + $0x38] sm:$0xff] %v2480_v0 }
  0x38   : > { %244 = vst [vmem:[#allocation2 + $0x50] sm:$0xff] %v2480_v0 }
  0x39   : > { %245 = vst [vmem:[#allocation2 + $0x70] sm:$0xff] %v2480_v0 }
  0x3a   : > { %246 = vst [vmem:[#allocation2 + $0xa0] sm:$0xff] %v2480_v0 }
  0x3b   : > { %247 = vst [vmem:[#allocation2 + $0xa8] sm:$0xff] %v2480_v0 }
  0x3c   : > { %248 = vst [vmem:[#allocation2 + $0x68] sm:$0xff] %v2480_v0 }
  0x3d   : > { %249 = vst [vmem:[#allocation2 + $0x30] sm:$0xff] %v2480_v0 }
  0x3e   : > { %250 = vst [vmem:[#allocation2 + $0x58] sm:$0xff] %v2480_v0 }
  0x3f   : > { %251 = vst [vmem:[#allocation2 + $0x80] sm:$0xff] %v2480_v0 }
  0x40   : > { %252 = vst [vmem:[#allocation2 + $0xb8] sm:$0xff] %v2480_v0 }
  0x41   : > { %253 = vst [vmem:[#allocation2 + $0x20] sm:$0xff] %v2480_v0 }
  0x42   : > { %254 = vst [vmem:[#allocation2 + $0x8] sm:$0xff] %v2480_v0 }
  0x43 PF: > { %v321_v1 = vld [vmem:[%s2742_s30] sm:$0x3]  ;;  %vm359_vm0 = vcmask 1041408   ;;  %s2752_s5 = smul.u32 192, %s2585_s23  ;;  %v2158_v3 = vld [vmem:[%s2742_s30 + $0x4] sm:$0x3] }
  0x44   : > { %v361_v2 = vsel %vm359_vm0, %v321_v1, 0  ;;  %s1947_s6 = smul.u32 4294967271, %s2731_s28  ;;  %v2171_v4 = vld [vmem:[%s2742_s30 + $0x6] sm:$0x3]  ;;  %v707_v5 = vsel %vm359_vm0, %v2158_v3, 0  ;;  %vm322_vm1 = vcmask 31744  }
  0x45   : > { %2383 = vmatpush.bf16.msra.mxu1 %v361_v2  ;;  %2384 = vmatpush.bf16.msra.mxu2 %v361_v2  ;;  %v879_v6 = vsel %vm359_vm0, %v2171_v4, 0  ;;  %v2119_v7 = vld [vmem:[%s2742_s30 + $0x2] sm:$0x3]  ;;  %v2210_v8 = vld [vmem:[%s2742_s30 + $0x8] sm:$0x3]  ;;  %s255_s18 = sadd.s32 4, %s2053_s17 }
  0x46   : > { %2385 = vmatpush.bf16.msra.mxu3 %v361_v2  ;;  %370 = vmatpush.bf16.msra.mxu0 %v361_v2  ;;  %s1948_s14 = sadd.s32 %s2752_s5, %s1947_s6  ;;  %v534_v9 = vsel %vm359_vm0, %v2119_v7, 0  ;;  %v1050_v10 = vsel %vm359_vm0, %v2210_v8, 0  ;;  %v2288_v35 = vld [vmem:[%s2742_s30 + $0xc] sm:$0x3]  ;;  %v2327_v37 = vld [vmem:[%s2742_s30 + $0xe] sm:$0x3] }
  0x47   : > { %s2766_s15 = scalar_lea.vmem %s2737_s11, %s1948_s14  ;;  %v1395_v36 = vsel %vm359_vm0, %v2288_v35, 0  ;;  %v2249_v38 = vld [vmem:[%s2742_s30 + $0xa] sm:$0x3]  ;;  %v1568_v39 = vsel %vm359_vm0, %v2327_v37, 0  ;;  %v2366_v41 = vld [vmem:[%s2742_s30 + $0x10] sm:$0x3] }
  0x48   : > { %v2063_v11 = vld [vmem:[%s2766_s15 + $0x94] sm:$0xff]  ;;  %v2064_v12 = vld [vmem:[%s2766_s15 + $0x9c] sm:$0xff]  ;;  %v2069_v13 = vld [vmem:[%s2766_s15 + $0xc4] sm:$0xff]  ;;  %v1222_v40 = vsel %vm359_vm0, %v2249_v38, 0  ;;  %v1741_v42 = vsel %vm359_vm0, %v2366_v41, 0  ;;  %s256_s30 = smul.u32 24, %s255_s18  ;;  %s2830_s18 = scalar_lea.vmem %s2737_s11, %s2752_s5 }
  0x49   : > { %716 = vmatpush.bf16.msrb.mxu2 %v707_v5  ;;  %543 = vmatpush.bf16.msrb.mxu1 %v534_v9  ;;  %v312_v14 = vpack.c.bf16 %v2064_v12, %v2063_v11  ;;  %v2070_v15 = vld [vmem:[%s2766_s15 + $0xcc] sm:$0xff]  ;;  %v2075_v16 = vld [vmem:[%s2766_s15 + $0xf4] sm:$0xff]  ;;  %v2076_v17 = vld [vmem:[%s2766_s15 + $0xfc] sm:$0xff]  ;;  %s1953_s29 = smul.u32 4294967272, %s2731_s28  ;;  %p2379_p2 = scmp.ne.s32.totalorder %s2581_s22, 2 }
  0x4a   : > { %888 = vmatpush.bf16.msrb.mxu3 %v879_v6  ;;  %1059 = vmatpush.bf16.msrb.mxu0 %v1050_v10  ;;  %v315_v18 = vpack.c.bf16 %v2070_v15, %v2069_v13  ;;  %v318_v19 = vpack.c.bf16 %v2076_v17, %v2075_v16  ;;  %v2057_v20 = vld [vmem:[%s2766_s15 + $0x64] sm:$0xff]  ;;  %v2058_v21 = vld [vmem:[%s2766_s15 + $0x6c] sm:$0xff]  ;;  %v2071_v25 = vld [vmem:[%s2766_s15 + $0xd4] sm:$0xff]  ;;  %s1959_s9 = smul.u32 4294967273, %s2731_s28  ;;  %s257_s17 = sadd.s32 4, %s256_s30 }
  0x4b   : > { %2084 = vmatmul.msk.bf16.vlgmr.msra.gmra.mxu1 %vm322_vm1, %v312_v14  ;;  %v309_v22 = vpack.c.bf16 %v2058_v21, %v2057_v20  ;;  %v2065_v23 = vld [vmem:[%s2766_s15 + $0xa4] sm:$0xff]  ;;  %v2066_v24 = vld [vmem:[%s2766_s15 + $0xac] sm:$0xff]  ;;  %v2072_v26 = vld [vmem:[%s2766_s15 + $0xdc] sm:$0xff]  ;;  %s1954_s10 = sadd.s32 %s2752_s5, %s1953_s29  ;;  %s802_s16 = ssub.s32 %s257_s17, %s2731_s28 }
  0x4c   : > { %2087 = vmatmul.msk.bf16.vlgmr.msra.gmra.mxu2 %vm322_vm1, %v315_v18  ;;  %2090 = vmatmul.msk.bf16.vlgmr.msra.gmra.mxu3 %vm322_vm1, %v318_v19  ;;  %v2077_v27 = vld [vmem:[%s2766_s15 + $0x104] sm:$0xff]  ;;  %v2078_v28 = vld [vmem:[%s2766_s15 + $0x10c] sm:$0xff]  ;;  %v2059_v29 = vld [vmem:[%s2766_s15 + $0x74] sm:$0xff]  ;;  %v313_v31 = vpack.c.bf16 %v2066_v24, %v2065_v23  ;;  %v316_v32 = vpack.c.bf16 %v2072_v26, %v2071_v25  ;;  %s1960_s12 = sadd.s32 %s2752_s5, %s1959_s9  ;;  %s2820_s6 = scalar_lea.vmem %s2737_s11, %s1954_s10 }
  0x4d   : > { %2081 = vmatmul.msk.bf16.vlgmr.msra.gmra.mxu0 %vm322_vm1, %v309_v22  ;;  %v2060_v30 = vld [vmem:[%s2766_s15 + $0x7c] sm:$0xff]  ;;  %v319_v33 = vpack.c.bf16 %v2078_v28, %v2077_v27  ;;  %1404 = vmatpush.bf16.msra.mxu2 %v1395_v36  ;;  %v2067_v43 = vld [vmem:[%s2766_s15 + $0xb4] sm:$0xff]  ;;  %v2073_v45 = vld [vmem:[%s2766_s15 + $0xe4] sm:$0xff]  ;;  %s2823_s14 = scalar_lea.vmem %s2737_s11, %s1960_s12  ;;  %s1975_s30 = smul.u32 23, %s2731_s28 }
  0x4e   : > { %v310_v34 = vpack.c.bf16 %v2060_v30, %v2059_v29  ;;  %1577 = vmatpush.bf16.msra.mxu3 %v1568_v39  ;;  %1231 = vmatpush.bf16.msra.mxu1 %v1222_v40  ;;  %v2068_v44 = vld [vmem:[%s2766_s15 + $0xbc] sm:$0xff]  ;;  %v2074_v46 = vld [vmem:[%s2766_s15 + $0xec] sm:$0xff]  ;;  %v2079_v47 = vld [vmem:[%s2766_s15 + $0x114] sm:$0xff]  ;;  %s1981_s29 = smul.u32 24, %s2731_s28  ;;  %s1970_s17 = sadd.s32 %s2752_s5, %s2731_s28 }
  0x4f   : > { %1750 = vmatpush.bf16.msra.mxu0 %v1741_v42  ;;  %v2080_v48 = vld [vmem:[%s2766_s15 + $0x11c] sm:$0xff]  ;;  %v2061_v49 = vld [vmem:[%s2766_s15 + $0x84] sm:$0xff]  ;;  %v2062_v50 = vld [vmem:[%s2766_s15 + $0x8c] sm:$0xff]  ;;  %v314_v51 = vpack.c.bf16 %v2068_v44, %v2067_v43  ;;  %v317_v52 = vpack.c.bf16 %v2074_v46, %v2073_v45  ;;  %s2826_s15 = scalar_lea.vmem %s2737_s11, %s802_s16  ;;  %s1987_s9 = smul.u32 25, %s2731_s28 }
  0x50   : > { %v320_v53 = vpack.c.bf16 %v2080_v48, %v2079_v47  ;;  %v311_v54 = vpack.c.bf16 %v2062_v50, %v2061_v49  ;;  %v2095_v55 = vld [vmem:[%s2820_s6 + $0x64] sm:$0xff]  ;;  %v2096_v56 = vld [vmem:[%s2820_s6 + $0x6c] sm:$0xff]  ;;  %v2097_v3 = vld [vmem:[%s2820_s6 + $0x74] sm:$0xff]  ;;  %s1976_s10 = sadd.s32 %s2752_s5, %s1975_s30  ;;  %s1982_s12 = sadd.s32 %s2752_s5, %s1981_s29 }
  0x51   : > { %v2134_v57 = vld [vmem:[%s2823_s14 + $0x64] sm:$0xff]  ;;  %v2135_v58 = vld [vmem:[%s2823_s14 + $0x6c] sm:$0xff]  ;;  %v483_v63 = vpack.c.bf16 %v2096_v56, %v2095_v55  ;;  %v2098_v4 = vld [vmem:[%s2820_s6 + $0x7c] sm:$0xff]  ;;  %s1988_s16 = sadd.s32 %s2752_s5, %s1987_s9  ;;  %s3059_s28 = scalar_lea.vmem %s2737_s11, %s1982_s12 }
  0x52   : > { %v804_v59 = vld [vmem:[%s2826_s15] sm:$0xff]  ;;  %v805_v60 = vld [vmem:[%s2826_s15 + $0x8] sm:$0xff]  ;;  %v656_v0 = vpack.c.bf16 %v2135_v58, %v2134_v57  ;;  %v2136_v5 = vld [vmem:[%s2823_s14 + $0x74] sm:$0xff]  ;;  %v484_v11 = vpack.c.bf16 %v2098_v4, %v2097_v3 }
  0x53   : > { %v2186_v61 = vld [vmem:[%s2830_s18 + $0x64] sm:$0xff]  ;;  %v2187_v62 = vld [vmem:[%s2830_s18 + $0x6c] sm:$0xff]  ;;  %v828_v1 = vpack.c.bf16 %v805_v60, %v804_v59  ;;  %v2137_v6 = vld [vmem:[%s2823_s14 + $0x7c] sm:$0xff] }
  0x54   : > { %v999_v2 = vpack.c.bf16 %v2187_v62, %v2186_v61  ;;  %v806_v7 = vld [vmem:[%s2826_s15 + $0x10] sm:$0xff]  ;;  %v807_v8 = vld [vmem:[%s2826_s15 + $0x18] sm:$0xff]  ;;  %v657_v12 = vpack.c.bf16 %v2137_v6, %v2136_v5  ;;  %v2099_v15 = vld [vmem:[%s2820_s6 + $0x84] sm:$0xff] }
  0x55   : > { %v2188_v9 = vld [vmem:[%s2830_s18 + $0x74] sm:$0xff]  ;;  %v2189_v10 = vld [vmem:[%s2830_s18 + $0x7c] sm:$0xff]  ;;  %v829_v13 = vpack.c.bf16 %v807_v8, %v806_v7  ;;  %v2100_v16 = vld [vmem:[%s2820_s6 + $0x8c] sm:$0xff] }
  0x56   : > { %v1000_v14 = vpack.c.bf16 %v2189_v10, %v2188_v9  ;;  %v2138_v17 = vld [vmem:[%s2823_s14 + $0x84] sm:$0xff]  ;;  %v2139_v18 = vld [vmem:[%s2823_s14 + $0x8c] sm:$0xff]  ;;  %v485_v23 = vpack.c.bf16 %v2100_v16, %v2099_v15  ;;  %v2101_v27 = vld [vmem:[%s2820_s6 + $0x94] sm:$0xff] }
  0x57   : > { %v808_v19 = vld [vmem:[%s2826_s15 + $0x20] sm:$0xff]  ;;  %v809_v20 = vld [vmem:[%s2826_s15 + $0x28] sm:$0xff]  ;;  %v658_v24 = vpack.c.bf16 %v2139_v18, %v2138_v17  ;;  %v2140_v29 = vld [vmem:[%s2823_s14 + $0x94] sm:$0xff] }
  0x58   : > { %v2190_v21 = vld [vmem:[%s2830_s18 + $0x84] sm:$0xff]  ;;  %v2191_v22 = vld [vmem:[%s2830_s18 + $0x8c] sm:$0xff]  ;;  %v830_v25 = vpack.c.bf16 %v809_v20, %v808_v19  ;;  %v2102_v28 = vld [vmem:[%s2820_s6 + $0x9c] sm:$0xff] }
  0x59   : > { %v1001_v26 = vpack.c.bf16 %v2191_v22, %v2190_v21  ;;  %v2141_v30 = vld [vmem:[%s2823_s14 + $0x9c] sm:$0xff]  ;;  %v486_v35 = vpack.c.bf16 %v2102_v28, %v2101_v27  ;;  %v2103_v39 = vld [vmem:[%s2820_s6 + $0xa4] sm:$0xff]  ;;  %v2104_v40 = vld [vmem:[%s2820_s6 + $0xac] sm:$0xff] }
  0x5a   : > { %v659_v36 = vpack.c.bf16 %v2141_v30, %v2140_v29  ;;  %v2142_v41 = vld [vmem:[%s2823_s14 + $0xa4] sm:$0xff]  ;;  %v2143_v42 = vld [vmem:[%s2823_s14 + $0xac] sm:$0xff]  ;;  %v487_v47 = vpack.c.bf16 %v2104_v40, %v2103_v39  ;;  %v815_v56 = vld [vmem:[%s2826_s15 + $0x58] sm:$0xff] }
  0x5b   : > { %2085 = vmatmul.msk.bf16.gmra.mxu1 %vm322_vm1, %v313_v31  ;;  %v810_v31 = vld [vmem:[%s2826_s15 + $0x30] sm:$0xff]  ;;  %v812_v43 = vld [vmem:[%s2826_s15 + $0x40] sm:$0xff]  ;;  %v813_v44 = vld [vmem:[%s2826_s15 + $0x48] sm:$0xff]  ;;  %v660_v48 = vpack.c.bf16 %v2143_v42, %v2142_v41 }
  0x5c   : > { %2088 = vmatmul.msk.bf16.gmra.mxu2 %vm322_vm1, %v316_v32  ;;  %2091 = vmatmul.msk.bf16.gmra.mxu3 %vm322_vm1, %v319_v33  ;;  %v811_v32 = vld [vmem:[%s2826_s15 + $0x38] sm:$0xff]  ;;  %v2194_v45 = vld [vmem:[%s2830_s18 + $0xa4] sm:$0xff]  ;;  %v2195_v46 = vld [vmem:[%s2830_s18 + $0xac] sm:$0xff]  ;;  %v832_v49 = vpack.c.bf16 %v813_v44, %v812_v43 }
  0x5d   : > { %2082 = vmatmul.msk.bf16.gmra.mxu0 %vm322_vm1, %v310_v34  ;;  %v2192_v33 = vld [vmem:[%s2830_s18 + $0x94] sm:$0xff]  ;;  %v2193_v34 = vld [vmem:[%s2830_s18 + $0x9c] sm:$0xff]  ;;  %v831_v37 = vpack.c.bf16 %v811_v32, %v810_v31  ;;  %v1003_v50 = vpack.c.bf16 %v2195_v46, %v2194_v45  ;;  %v2107_v5 = vld [vmem:[%s2820_s6 + $0xc4] sm:$0xff] }
  0x5e   : > { %v1002_v38 = vpack.c.bf16 %v2193_v34, %v2192_v33  ;;  %v814_v55 = vld [vmem:[%s2826_s15 + $0x50] sm:$0xff]  ;;  %v2197_v58 = vld [vmem:[%s2830_s18 + $0xbc] sm:$0xff]  ;;  %v2146_v7 = vld [vmem:[%s2823_s14 + $0xc4] sm:$0xff] }
  0x5f   : > { %v2196_v57 = vld [vmem:[%s2830_s18 + $0xb4] sm:$0xff]  ;;  %v833_v62 = vpack.c.bf16 %v815_v56, %v814_v55  ;;  %v2108_v6 = vld [vmem:[%s2820_s6 + $0xcc] sm:$0xff]  ;;  %v816_v9 = vld [vmem:[%s2826_s15 + $0x60] sm:$0xff] }
  0x60   : > { %v2147_v8 = vld [vmem:[%s2823_s14 + $0xcc] sm:$0xff]  ;;  %v489_v15 = vpack.c.bf16 %v2108_v6, %v2107_v5  ;;  %v2148_v27 = vld [vmem:[%s2823_s14 + $0xd4] sm:$0xff]  ;;  %v2149_v28 = vld [vmem:[%s2823_s14 + $0xdc] sm:$0xff] }
  0x61   : > { %v817_v10 = vld [vmem:[%s2826_s15 + $0x68] sm:$0xff]  ;;  %v662_v17 = vpack.c.bf16 %v2147_v8, %v2146_v7  ;;  %v818_v29 = vld [vmem:[%s2826_s15 + $0x70] sm:$0xff]  ;;  %v819_v30 = vld [vmem:[%s2826_s15 + $0x78] sm:$0xff] }
  0x62   : > { %v834_v18 = vpack.c.bf16 %v817_v10, %v816_v9  ;;  %v2200_v31 = vld [vmem:[%s2830_s18 + $0xd4] sm:$0xff]  ;;  %v2201_v32 = vld [vmem:[%s2830_s18 + $0xdc] sm:$0xff]  ;;  %v2111_v46 = vld [vmem:[%s2820_s6 + $0xe4] sm:$0xff] }
  0x63   : > { %v1006_v39 = vpack.c.bf16 %v2201_v32, %v2200_v31  ;;  %v258_v45 = vld [vmem:[#allocation2 + $0xb0] sm:$0xff]  ;;  %v259_v6 = vld [vmem:[#allocation2] sm:$0xff] }
  0x6b   : > { %2086 = vmatmul.msk.bf16.gmra.mxu1 %vm322_vm1, %v314_v51  ;;  %v2105_v51 = vld [vmem:[%s2820_s6 + $0xb4] sm:$0xff] }
  0x6c   : > { %2089 = vmatmul.msk.bf16.gmra.mxu2 %vm322_vm1, %v317_v52  ;;  %2092 = vmatmul.msk.bf16.gmra.mxu3 %vm322_vm1, %v320_v53  ;;  %v2106_v52 = vld [vmem:[%s2820_s6 + $0xbc] sm:$0xff]  ;;  %v2144_v53 = vld [vmem:[%s2823_s14 + $0xb4] sm:$0xff] }
  0x6d   : > { %2083 = vmatmul.msk.bf16.gmra.mxu0 %vm322_vm1, %v311_v54  ;;  %v2145_v54 = vld [vmem:[%s2823_s14 + $0xbc] sm:$0xff]  ;;  %v488_v59 = vpack.c.bf16 %v2106_v52, %v2105_v51  ;;  %v821_v51 = vld [vmem:[%s2826_s15 + $0x88] sm:$0xff] }
  0x6e   : > { %v661_v61 = vpack.c.bf16 %v2145_v54, %v2144_v53  ;;  %v2202_v52 = vld [vmem:[%s2830_s18 + $0xe4] sm:$0xff]  ;;  %v2203_v53 = vld [vmem:[%s2830_s18 + $0xec] sm:$0xff] }
  0x7b   : > { %2120 = vmatmul.msk.bf16.vlgmr.msrb.gmra.mxu1 %vm322_vm1, %v483_v63  ;;  %v1004_v63 = vpack.c.bf16 %v2197_v58, %v2196_v57 }
  0x7c   : > { %2159 = vmatmul.msk.bf16.vlgmr.msrb.gmra.mxu2 %vm322_vm1, %v656_v0  ;;  %2172 = vmatmul.msk.bf16.vlgmr.msrb.gmra.mxu3 %vm322_vm1, %v828_v1 }
  0x7d   : > { %2211 = vmatmul.msk.bf16.vlgmr.msrb.gmra.mxu0 %vm322_vm1, %v999_v2 }
  0x8b   : > { %2121 = vmatmul.msk.bf16.gmra.mxu1 %vm322_vm1, %v484_v11  ;;  %v2198_v11 = vld [vmem:[%s2830_s18 + $0xc4] sm:$0xff] }
  0x8c   : > { %2160 = vmatmul.msk.bf16.gmra.mxu2 %vm322_vm1, %v657_v12  ;;  %2173 = vmatmul.msk.bf16.gmra.mxu3 %vm322_vm1, %v829_v13  ;;  %v2199_v12 = vld [vmem:[%s2830_s18 + $0xcc] sm:$0xff] }
  0x8d   : > { %2212 = vmatmul.msk.bf16.gmra.mxu0 %vm322_vm1, %v1000_v14  ;;  %v1005_v19 = vpack.c.bf16 %v2199_v12, %v2198_v11 }
  0x9b   : > { %2122 = vmatmul.msk.bf16.gmra.mxu1 %vm322_vm1, %v485_v23 }
  0x9c   : > { %2161 = vmatmul.msk.bf16.gmra.mxu2 %vm322_vm1, %v658_v24  ;;  %2174 = vmatmul.msk.bf16.gmra.mxu3 %vm322_vm1, %v830_v25  ;;  %v2109_v25 = vld [vmem:[%s2820_s6 + $0xd4] sm:$0xff] }
  0x9d   : > { %2213 = vmatmul.msk.bf16.gmra.mxu0 %vm322_vm1, %v1001_v26  ;;  %v2110_v26 = vld [vmem:[%s2820_s6 + $0xdc] sm:$0xff] }
  0xab   : > { %2123 = vmatmul.msk.bf16.gmra.mxu1 %vm322_vm1, %v486_v35  ;;  %v490_v35 = vpack.c.bf16 %v2110_v26, %v2109_v25  ;;  %v2152_v25 = vld [vmem:[%s2823_s14 + $0xf4] sm:$0xff] }
  0xac   : > { %2162 = vmatmul.msk.bf16.gmra.mxu2 %vm322_vm1, %v659_v36  ;;  %2175 = vmatmul.msk.bf16.gmra.mxu3 %vm322_vm1, %v831_v37  ;;  %v663_v37 = vpack.c.bf16 %v2149_v28, %v2148_v27  ;;  %v2153_v27 = vld [vmem:[%s2823_s14 + $0xfc] sm:$0xff]  ;;  %v822_v28 = vld [vmem:[%s2826_s15 + $0x90] sm:$0xff] }
  0xad   : > { %2214 = vmatmul.msk.bf16.gmra.mxu0 %vm322_vm1, %v1002_v38  ;;  %v835_v38 = vpack.c.bf16 %v819_v30, %v818_v29  ;;  %v823_v29 = vld [vmem:[%s2826_s15 + $0x98] sm:$0xff] }
  0xae   : > { %v2204_v30 = vld [vmem:[%s2830_s18 + $0xf4] sm:$0xff] }
  0xbb   : > { %2124 = vmatmul.msk.bf16.gmra.mxu1 %vm322_vm1, %v487_v47  ;;  %v2112_v47 = vld [vmem:[%s2820_s6 + $0xec] sm:$0xff] }
  0xbc   : > { %2163 = vmatmul.msk.bf16.gmra.mxu2 %vm322_vm1, %v660_v48  ;;  %2176 = vmatmul.msk.bf16.gmra.mxu3 %vm322_vm1, %v832_v49  ;;  %v2150_v48 = vld [vmem:[%s2823_s14 + $0xe4] sm:$0xff]  ;;  %v2151_v49 = vld [vmem:[%s2823_s14 + $0xec] sm:$0xff]  ;;  %v491_v57 = vpack.c.bf16 %v2112_v47, %v2111_v46  ;;  %v837_v46 = vpack.c.bf16 %v823_v29, %v822_v28 }
  0xbd   : > { %2215 = vmatmul.msk.bf16.gmra.mxu0 %vm322_vm1, %v1003_v50  ;;  %v820_v50 = vld [vmem:[%s2826_s15 + $0x80] sm:$0xff] }
  0xc8   : > { %v2900_v60 = vpop.f32.mrf.mxu1 }
  0xca   : > { %v2902_v0 = vpop.f32.mrf.mxu0 }
  0xcb   : > { %2125 = vmatmul.msk.bf16.gmra.mxu1 %vm322_vm1, %v488_v59  ;;  %v432_v54 = vadd.f32 %v2902_v0, %v258_v45  ;;  %v664_v59 = vpack.c.bf16 %v2151_v49, %v2150_v48  ;;  %v665_v45 = vpack.c.bf16 %v2153_v27, %v2152_v25 }
  0xcc   : > { %2164 = vmatmul.msk.bf16.gmra.mxu2 %vm322_vm1, %v661_v61  ;;  %2177 = vmatmul.msk.bf16.gmra.mxu3 %vm322_vm1, %v833_v62  ;;  %v836_v61 = vpack.c.bf16 %v821_v51, %v820_v50  ;;  %v261_v51 = vld [vmem:[#allocation2 + $0x48] sm:$0xff] }
  0xcd   : > { %2216 = vmatmul.msk.bf16.gmra.mxu0 %vm322_vm1, %v1004_v63  ;;  %v1007_v63 = vpack.c.bf16 %v2203_v53, %v2202_v52 }
  0xcf   : > { %v2908_v1 = vpop.f32.mrf.mxu2  ;;  %v2910_v2 = vpop.f32.mrf.mxu3 }
  0xd0   : > { %v2912_v3 = vpop.f32.mrf.mxu1 }
  0xd2   : > { %v2914_v4 = vpop.f32.mrf.mxu0 }
  0xd3   : > { %v433_v0 = vadd.f32 %v2914_v4, %v259_v6  ;;  %v2205_v4 = vld [vmem:[%s2830_s18 + $0xfc] sm:$0xff]  ;;  %v2116_v6 = vld [vmem:[%s2820_s6 + $0x10c] sm:$0xff] }
  0xd4   : > { %v1008_v48 = vpack.c.bf16 %v2205_v4, %v2204_v30 }
  0xd7   : > { %v2924_v13 = vpop.f32.mrf.mxu2  ;;  %v2926_v14 = vpop.f32.mrf.mxu3 }
  0xd8   : > { %v2928_v16 = vpop.f32.mrf.mxu1 }
  0xda   : > { %v2930_v20 = vpop.f32.mrf.mxu0 }
  0xdb   : > { %2126 = vmatmul.msk.bf16.gmra.mxu1 %vm322_vm1, %v489_v15 }
  0xdc   : > { %2165 = vmatmul.msk.bf16.gmra.mxu2 %vm322_vm1, %v662_v17  ;;  %2178 = vmatmul.msk.bf16.gmra.mxu3 %vm322_vm1, %v834_v18  ;;  %v260_v17 = vld [vmem:[#allocation2 + $0x10] sm:$0xff] }
  0xdd   : > { %2217 = vmatmul.msk.bf16.gmra.mxu0 %vm322_vm1, %v1005_v19  ;;  %v2113_v18 = vld [vmem:[%s2820_s6 + $0xf4] sm:$0xff]  ;;  %v2114_v19 = vld [vmem:[%s2820_s6 + $0xfc] sm:$0xff]  ;;  %v434_v31 = vadd.f32 %v2930_v20, %v260_v17 }
  0xdf   : > { %v2936_v21 = vpop.f32.mrf.mxu2  ;;  %v2938_v22 = vpop.f32.mrf.mxu3 }
  0xe0   : > { %v2940_v23 = vpop.f32.mrf.mxu1 }
  0xe2   : > { %v2942_v24 = vpop.f32.mrf.mxu0 }
  0xe3   : > { %v435_v52 = vadd.f32 %v2942_v24, %v261_v51  ;;  %v2207_v24 = vld [vmem:[%s2830_s18 + $0x10c] sm:$0xff]  ;;  %v2118_v51 = vld [vmem:[%s2820_s6 + $0x11c] sm:$0xff] }
  0xe7   : > { %v2952_v33 = vpop.f32.mrf.mxu2  ;;  %v2954_v34 = vpop.f32.mrf.mxu3 }
  0xe8   : > { %v2956_v36 = vpop.f32.mrf.mxu1 }
  0xea   : > { %v2958_v40 = vpop.f32.mrf.mxu0 }
  0xeb   : > { %2127 = vmatmul.msk.bf16.gmra.mxu1 %vm322_vm1, %v490_v35 }
  0xec   : > { %2166 = vmatmul.msk.bf16.gmra.mxu2 %vm322_vm1, %v663_v37  ;;  %2179 = vmatmul.msk.bf16.gmra.mxu3 %vm322_vm1, %v835_v38  ;;  %v492_v37 = vpack.c.bf16 %v2114_v19, %v2113_v18 }
  0xed   : > { %2218 = vmatmul.msk.bf16.gmra.mxu0 %vm322_vm1, %v1006_v39 }
  0xef   : > { %v2964_v41 = vpop.f32.mrf.mxu2  ;;  %v2966_v42 = vpop.f32.mrf.mxu3 }
  0xf0   : > { %v2968_v43 = vpop.f32.mrf.mxu1 }
  0xf2   : > { %v2970_v44 = vpop.f32.mrf.mxu0 }
  0xf7   : > { %v2981_v55 = vpop.f32.mrf.mxu2  ;;  %v2983_v56 = vpop.f32.mrf.mxu3 }
  0xf8   : > { %v545_v58 = vpop.f32.mrf.mxu1 }
  0xf9   : > { %v605_v62 = vadd.f32 %v545_v58, %v432_v54 }
  0xfa   : > { %v1061_v5 = vpop.f32.mrf.mxu0 }
  0xfb   : > { %2128 = vmatmul.msk.bf16.gmra.mxu1 %vm322_vm1, %v491_v57 }
  0xfc   : > { %2167 = vmatmul.msk.bf16.gmra.mxu2 %vm322_vm1, %v664_v59  ;;  %2180 = vmatmul.msk.bf16.gmra.mxu3 %vm322_vm1, %v836_v61 }
  0xfd   : > { %2219 = vmatmul.msk.bf16.gmra.mxu0 %vm322_vm1, %v1007_v63  ;;  %v262_v63 = vld [vmem:[#allocation2 + $0x60] sm:$0xff] }
  0xff   : > { %v718_v7 = vpop.f32.mrf.mxu2  ;;  %v890_v8 = vpop.f32.mrf.mxu3 }
 0x100   : > { %v778_v9 = vadd.f32 %v718_v7, %v605_v62  ;;  %v547_v10 = vpop.f32.mrf.mxu1 }
 0x101   : > { %v606_v11 = vadd.f32 %v547_v10, %v433_v0  ;;  %v2154_v0 = vld [vmem:[%s2823_s14 + $0x104] sm:$0xff] }
 0x102   : > { %v950_v12 = vadd.f32 %v890_v8, %v778_v9  ;;  %v1063_v15 = vpop.f32.mrf.mxu0  ;;  %v2155_v8 = vld [vmem:[%s2823_s14 + $0x10c] sm:$0xff]  ;;  %v824_v9 = vld [vmem:[%s2826_s15 + $0xa0] sm:$0xff] }
 0x103   : > { %v825_v10 = vld [vmem:[%s2826_s15 + $0xa8] sm:$0xff]  ;;  %v666_v27 = vpack.c.bf16 %v2155_v8, %v2154_v0 }
 0x104   : > { %v2993_v26 = vadd.f32 %v1061_v5, %v950_v12  ;;  %v2115_v5 = vld [vmem:[%s2820_s6 + $0x104] sm:$0xff]  ;;  %v436_v12 = vadd.f32 %v2958_v40, %v262_v63  ;;  %v838_v28 = vpack.c.bf16 %v825_v10, %v824_v9 }
 0x105   : > { %v493_v18 = vpack.c.bf16 %v2116_v6, %v2115_v5 }
 0x107   : > { %v720_v32 = vpop.f32.mrf.mxu2  ;;  %v892_v35 = vpop.f32.mrf.mxu3 }
 0x108   : > { %v779_v38 = vadd.f32 %v720_v32, %v606_v11  ;;  %v550_v39 = vpop.f32.mrf.mxu1  ;;  %v2206_v11 = vld [vmem:[%s2830_s18 + $0x104] sm:$0xff] }
 0x109   : > { %v607_v47 = vadd.f32 %v550_v39, %v434_v31  ;;  %v1009_v30 = vpack.c.bf16 %v2207_v24, %v2206_v11  ;;  %v263_v32 = vld [vmem:[#allocation2 + $0x28] sm:$0xff] }
 0x10a   : > { %v951_v49 = vadd.f32 %v892_v35, %v779_v38  ;;  %v1066_v50 = vpop.f32.mrf.mxu0  ;;  %v437_v35 = vadd.f32 %v2970_v44, %v263_v32  ;;  %v2208_v44 = vld [vmem:[%s2830_s18 + $0x114] sm:$0xff] }
 0x10b   : > { %2129 = vmatmul.msk.bf16.gmra.mxu1 %vm322_vm1, %v492_v37 }
 0x10c   : > { %2168 = vmatmul.msk.bf16.gmra.mxu2 %vm322_vm1, %v665_v45  ;;  %2181 = vmatmul.msk.bf16.gmra.mxu3 %vm322_vm1, %v837_v46  ;;  %v3004_v20 = vadd.f32 %v1063_v15, %v951_v49  ;;  %v264_v49 = vld [vmem:[#allocation2 + $0x40] sm:$0xff] }
 0x10d   : > { %2220 = vmatmul.msk.bf16.gmra.mxu0 %vm322_vm1, %v1008_v48 }
 0x10f   : > { %v723_v53 = vpop.f32.mrf.mxu2  ;;  %v895_v54 = vpop.f32.mrf.mxu3 }
 0x110   : > { %v780_v57 = vadd.f32 %v723_v53, %v607_v47  ;;  %v552_v58 = vpop.f32.mrf.mxu1 }
 0x111   : > { %v608_v59 = vadd.f32 %v552_v58, %v435_v52  ;;  %v2156_v52 = vld [vmem:[%s2823_s14 + $0x114] sm:$0xff] }
 0x112   : > { %v952_v61 = vadd.f32 %v895_v54, %v780_v57  ;;  %v1068_v62 = vpop.f32.mrf.mxu0  ;;  %v2157_v54 = vld [vmem:[%s2823_s14 + $0x11c] sm:$0xff]  ;;  %v826_v57 = vld [vmem:[%s2826_s15 + $0xb0] sm:$0xff]  ;;  %s3056_s14 = scalar_lea.vmem %s2737_s11, %s1976_s10 }
 0x113   : > { %v827_v58 = vld [vmem:[%s2826_s15 + $0xb8] sm:$0xff]  ;;  %v667_v8 = vpack.c.bf16 %v2157_v54, %v2156_v52  ;;  %s3062_s15 = scalar_lea.vmem %s2737_s11, %s1988_s16  ;;  %v2264_v32 = vld [vmem:[%s3056_s14 + $0x64] sm:$0xff] }
 0x114   : > { %v3011_v7 = vadd.f32 %v1066_v50, %v952_v61  ;;  %v2117_v50 = vld [vmem:[%s2820_s6 + $0x114] sm:$0xff]  ;;  %v438_v61 = vadd.f32 %v2900_v60, %v264_v49  ;;  %v839_v9 = vpack.c.bf16 %v827_v58, %v826_v57  ;;  %s3053_s6 = scalar_lea.vmem %s2737_s11, %s1970_s17 }
 0x115   : > { %v494_v5 = vpack.c.bf16 %v2118_v51, %v2117_v50  ;;  %v265_v60 = vld [vmem:[#allocation2 + $0x78] sm:$0xff] }
 0x117   : > { %v725_v15 = vpop.f32.mrf.mxu2  ;;  %v897_v17 = vpop.f32.mrf.mxu3 }
 0x118   : > { %v781_v19 = vadd.f32 %v725_v15, %v608_v59  ;;  %v555_v25 = vpop.f32.mrf.mxu1  ;;  %v2209_v59 = vld [vmem:[%s2830_s18 + $0x11c] sm:$0xff] }
 0x119   : > { %v609_v29 = vadd.f32 %v555_v25, %v436_v12  ;;  %v1010_v11 = vpack.c.bf16 %v2209_v59, %v2208_v44 }
 0x11a   : > { %v953_v4 = vadd.f32 %v897_v17, %v781_v19  ;;  %v1071_v31 = vpop.f32.mrf.mxu0  ;;  %v439_v17 = vadd.f32 %v2912_v3, %v265_v60  ;;  %v266_v3 = vld [vmem:[#allocation2 + $0x88] sm:$0xff]  ;;  %v2228_v60 = vld [vmem:[%s3053_s6 + $0x7c] sm:$0xff] }
 0x11b   : > { %2130 = vmatmul.msk.bf16.gmra.mxu1 %vm322_vm1, %v493_v18 }
 0x11c   : > { %2169 = vmatmul.msk.bf16.gmra.mxu2 %vm322_vm1, %v666_v27  ;;  %2182 = vmatmul.msk.bf16.gmra.mxu3 %vm322_vm1, %v838_v28  ;;  %v3022_v40 = vadd.f32 %v1068_v62, %v953_v4  ;;  %v2225_v4 = vld [vmem:[%s3053_s6 + $0x64] sm:$0xff] }
 0x11d   : > { %2221 = vmatmul.msk.bf16.gmra.mxu0 %vm322_vm1, %v1009_v30 }
 0x11f   : > { %v728_v37 = vpop.f32.mrf.mxu2  ;;  %v900_v38 = vpop.f32.mrf.mxu3 }
 0x120   : > { %v782_v39 = vadd.f32 %v728_v37, %v609_v29  ;;  %v557_v45 = vpop.f32.mrf.mxu1  ;;  %v2265_v37 = vld [vmem:[%s3056_s14 + $0x6c] sm:$0xff] }
 0x121   : > { %v610_v46 = vadd.f32 %v557_v45, %v437_v35  ;;  %v2342_v45 = vld [vmem:[%s3062_s15 + $0x64] sm:$0xff]  ;;  %v1344_v54 = vpack.c.bf16 %v2265_v37, %v2264_v32 }
 0x122   : > { %v954_v47 = vadd.f32 %v900_v38, %v782_v39  ;;  %v1073_v48 = vpop.f32.mrf.mxu0  ;;  %v2303_v38 = vld [vmem:[%s3059_s28 + $0x64] sm:$0xff]  ;;  %v2304_v39 = vld [vmem:[%s3059_s28 + $0x6c] sm:$0xff] }
 0x123   : > { %v1517_v57 = vpack.c.bf16 %v2304_v39, %v2303_v38 }
 0x124   : > { %v3029_v53 = vadd.f32 %v1071_v31, %v954_v47  ;;  %v2226_v31 = vld [vmem:[%s3053_s6 + $0x6c] sm:$0xff]  ;;  %v440_v47 = vadd.f32 %v2928_v16, %v266_v3 }
 0x125   : > { %v1171_v50 = vpack.c.bf16 %v2226_v31, %v2225_v4 }
 0x127   : > { %v730_v62 = vpop.f32.mrf.mxu2  ;;  %v902_v63 = vpop.f32.mrf.mxu3 }
 0x128   : > { %v783_v6 = vadd.f32 %v730_v62, %v610_v46  ;;  %v560_v0 = vpop.f32.mrf.mxu1  ;;  %v2343_v46 = vld [vmem:[%s3062_s15 + $0x6c] sm:$0xff] }
 0x129   : > { %v611_v10 = vadd.f32 %v560_v0, %v438_v61  ;;  %v1690_v44 = vpack.c.bf16 %v2343_v46, %v2342_v45  ;;  %v267_v62 = vld [vmem:[#allocation2 + $0x90] sm:$0xff] }
 0x12a   : > { %v955_v24 = vadd.f32 %v902_v63, %v783_v6  ;;  %v1076_v12 = vpop.f32.mrf.mxu0  ;;  %v441_v63 = vadd.f32 %v2940_v23, %v267_v62  ;;  %v2345_v23 = vld [vmem:[%s3062_s15 + $0x7c] sm:$0xff]  ;;  %v2230_v62 = vld [vmem:[%s3053_s6 + $0x8c] sm:$0xff] }
 0x12b   : > { %2131 = vmatmul.msk.bf16.gmra.mxu1 %vm322_vm1, %v494_v5 }
 0x12c   : > { %2170 = vmatmul.msk.bf16.gmra.mxu2 %vm322_vm1, %v667_v8  ;;  %2183 = vmatmul.msk.bf16.gmra.mxu3 %vm322_vm1, %v839_v9  ;;  %v3043_v15 = vadd.f32 %v1073_v48, %v955_v24  ;;  %v268_v24 = vld [vmem:[#allocation2 + $0x18] sm:$0xff] }
 0x12d   : > { %2222 = vmatmul.msk.bf16.gmra.mxu0 %vm322_vm1, %v1010_v11 }
 0x12f   : > { %v733_v18 = vpop.f32.mrf.mxu2  ;;  %v905_v19 = vpop.f32.mrf.mxu3 }
 0x130   : > { %v784_v25 = vadd.f32 %v733_v18, %v611_v10  ;;  %v562_v27 = vpop.f32.mrf.mxu1 }
 0x131   : > { %v612_v28 = vadd.f32 %v562_v27, %v439_v17  ;;  %v2266_v17 = vld [vmem:[%s3056_s14 + $0x74] sm:$0xff]  ;;  %v2306_v27 = vld [vmem:[%s3059_s28 + $0x7c] sm:$0xff] }
 0x132   : > { %v956_v29 = vadd.f32 %v905_v19, %v784_v25  ;;  %v1078_v30 = vpop.f32.mrf.mxu0  ;;  %v2267_v19 = vld [vmem:[%s3056_s14 + $0x7c] sm:$0xff]  ;;  %v2305_v25 = vld [vmem:[%s3059_s28 + $0x74] sm:$0xff] }
 0x133   : > { %v1345_v37 = vpack.c.bf16 %v2267_v19, %v2266_v17  ;;  %v1518_v38 = vpack.c.bf16 %v2306_v27, %v2305_v25 }
 0x134   : > { %v3067_v35 = vadd.f32 %v1076_v12, %v956_v29  ;;  %v2227_v12 = vld [vmem:[%s3053_s6 + $0x74] sm:$0xff]  ;;  %v442_v29 = vadd.f32 %v2956_v36, %v268_v24 }
 0x135   : > { %v1172_v4 = vpack.c.bf16 %v2228_v60, %v2227_v12 }
 0x137   : > { %v735_v48 = vpop.f32.mrf.mxu2  ;;  %v907_v49 = vpop.f32.mrf.mxu3 }
 0x138   : > { %v785_v51 = vadd.f32 %v735_v48, %v612_v28  ;;  %v565_v52 = vpop.f32.mrf.mxu1  ;;  %v2344_v28 = vld [vmem:[%s3062_s15 + $0x74] sm:$0xff] }
 0x139   : > { %v613_v58 = vadd.f32 %v565_v52, %v440_v47  ;;  %v1691_v45 = vpack.c.bf16 %v2345_v23, %v2344_v28  ;;  %v269_v48 = vld [vmem:[#allocation2 + $0x98] sm:$0xff] }
 0x13a   : > { %v957_v59 = vadd.f32 %v907_v49, %v785_v51  ;;  %v1081_v61 = vpop.f32.mrf.mxu0  ;;  %v443_v49 = vadd.f32 %v2968_v43, %v269_v48  ;;  %v2347_v43 = vld [vmem:[%s3062_s15 + $0x8c] sm:$0xff]  ;;  %v2232_v48 = vld [vmem:[%s3053_s6 + $0x9c] sm:$0xff] }
 0x13b   : > { %2250 = vmatmul.msk.bf16.vlgmr.msra.gmra.mxu1 %vm322_vm1, %v1171_v50 }
 0x13c   : > { %2289 = vmatmul.msk.bf16.vlgmr.msra.gmra.mxu2 %vm322_vm1, %v1344_v54  ;;  %2328 = vmatmul.msk.bf16.vlgmr.msra.gmra.mxu3 %vm322_vm1, %v1517_v57  ;;  %v3078_v16 = vadd.f32 %v1078_v30, %v957_v59  ;;  %v270_v59 = vld [vmem:[#allocation2 + $0x38] sm:$0xff] }
 0x13d   : > { %2367 = vmatmul.msk.bf16.vlgmr.msra.gmra.mxu0 %vm322_vm1, %v1690_v44 }
 0x13f   : > { %v738_v5 = vpop.f32.mrf.mxu2  ;;  %v910_v6 = vpop.f32.mrf.mxu3 }
 0x140   : > { %v786_v0 = vadd.f32 %v738_v5, %v613_v58  ;;  %v567_v8 = vpop.f32.mrf.mxu1 }
 0x141   : > { %v614_v9 = vadd.f32 %v567_v8, %v441_v63  ;;  %v2268_v63 = vld [vmem:[%s3056_s14 + $0x84] sm:$0xff]  ;;  %v2308_v8 = vld [vmem:[%s3059_s28 + $0x8c] sm:$0xff] }
 0x142   : > { %v958_v10 = vadd.f32 %v910_v6, %v786_v0  ;;  %v1083_v11 = vpop.f32.mrf.mxu0  ;;  %v2269_v6 = vld [vmem:[%s3056_s14 + $0x8c] sm:$0xff]  ;;  %v2307_v0 = vld [vmem:[%s3059_s28 + $0x84] sm:$0xff] }
 0x143   : > { %v1346_v19 = vpack.c.bf16 %v2269_v6, %v2268_v63  ;;  %v1519_v25 = vpack.c.bf16 %v2308_v8, %v2307_v0 }
 0x144   : > { %v3085_v18 = vadd.f32 %v1081_v61, %v958_v10  ;;  %v2229_v61 = vld [vmem:[%s3053_s6 + $0x84] sm:$0xff]  ;;  %v444_v10 = vadd.f32 %v2908_v1, %v270_v59 }
 0x145   : > { %v1173_v12 = vpack.c.bf16 %v2230_v62, %v2229_v61 }
 0x147   : > { %v740_v30 = vpop.f32.mrf.mxu2  ;;  %v912_v3 = vpop.f32.mrf.mxu3 }
 0x148   : > { %v787_v31 = vadd.f32 %v740_v30, %v614_v9  ;;  %v570_v32 = vpop.f32.mrf.mxu1  ;;  %v2346_v9 = vld [vmem:[%s3062_s15 + $0x84] sm:$0xff]  ;;  %v271_v30 = vld [vmem:[#allocation2 + $0x50] sm:$0xff] }
 0x149   : > { %v615_v39 = vadd.f32 %v570_v32, %v442_v29  ;;  %v1692_v28 = vpack.c.bf16 %v2347_v43, %v2346_v9 }
 0x14a   : > { %v959_v46 = vadd.f32 %v912_v3, %v787_v31  ;;  %v1086_v47 = vpop.f32.mrf.mxu0  ;;  %v445_v3 = vadd.f32 %v2924_v13, %v271_v30  ;;  %v2349_v13 = vld [vmem:[%s3062_s15 + $0x9c] sm:$0xff]  ;;  %v2234_v30 = vld [vmem:[%s3053_s6 + $0xac] sm:$0xff] }
 0x14b   : > { %2251 = vmatmul.msk.bf16.gmra.mxu1 %vm322_vm1, %v1172_v4 }
 0x14c   : > { %2290 = vmatmul.msk.bf16.gmra.mxu2 %vm322_vm1, %v1345_v37  ;;  %2329 = vmatmul.msk.bf16.gmra.mxu3 %vm322_vm1, %v1518_v38  ;;  %v3096_v36 = vadd.f32 %v1083_v11, %v959_v46  ;;  %v272_v46 = vld [vmem:[#allocation2 + $0x70] sm:$0xff] }
 0x14d   : > { %2368 = vmatmul.msk.bf16.gmra.mxu0 %vm322_vm1, %v1691_v45 }
 0x14f   : > { %v743_v50 = vpop.f32.mrf.mxu2  ;;  %v915_v51 = vpop.f32.mrf.mxu3 }
 0x150   : > { %v788_v52 = vadd.f32 %v743_v50, %v615_v39  ;;  %v572_v54 = vpop.f32.mrf.mxu1 }
 0x151   : > { %v616_v57 = vadd.f32 %v572_v54, %v443_v49  ;;  %v2270_v49 = vld [vmem:[%s3056_s14 + $0x94] sm:$0xff]  ;;  %v2310_v54 = vld [vmem:[%s3059_s28 + $0x9c] sm:$0xff] }
 0x152   : > { %v960_v58 = vadd.f32 %v915_v51, %v788_v52  ;;  %v1088_v44 = vpop.f32.mrf.mxu0  ;;  %v2271_v51 = vld [vmem:[%s3056_s14 + $0x9c] sm:$0xff]  ;;  %v2309_v52 = vld [vmem:[%s3059_s28 + $0x94] sm:$0xff] }
 0x153   : > { %v1347_v6 = vpack.c.bf16 %v2271_v51, %v2270_v49  ;;  %v1520_v0 = vpack.c.bf16 %v2310_v54, %v2309_v52 }
 0x154   : > { %v3103_v5 = vadd.f32 %v1086_v47, %v960_v58  ;;  %v2231_v47 = vld [vmem:[%s3053_s6 + $0x94] sm:$0xff]  ;;  %v446_v58 = vadd.f32 %v2936_v21, %v272_v46 }
 0x155   : > { %v1174_v61 = vpack.c.bf16 %v2232_v48, %v2231_v47 }
 0x157   : > { %v745_v11 = vpop.f32.mrf.mxu2  ;;  %v917_v24 = vpop.f32.mrf.mxu3 }
 0x158   : > { %v789_v60 = vadd.f32 %v745_v11, %v616_v57  ;;  %v575_v17 = vpop.f32.mrf.mxu1  ;;  %v2348_v57 = vld [vmem:[%s3062_s15 + $0x94] sm:$0xff]  ;;  %v273_v11 = vld [vmem:[#allocation2 + $0xa0] sm:$0xff] }
 0x159   : > { %v617_v27 = vadd.f32 %v575_v17, %v444_v10  ;;  %v1693_v9 = vpack.c.bf16 %v2349_v13, %v2348_v57 }
 0x15a   : > { %v961_v23 = vadd.f32 %v917_v24, %v789_v60  ;;  %v1091_v29 = vpop.f32.mrf.mxu0  ;;  %v447_v24 = vadd.f32 %v2952_v33, %v273_v11  ;;  %v2351_v33 = vld [vmem:[%s3062_s15 + $0xac] sm:$0xff]  ;;  %v2236_v11 = vld [vmem:[%s3053_s6 + $0xbc] sm:$0xff] }
 0x15b   : > { %2252 = vmatmul.msk.bf16.gmra.mxu1 %vm322_vm1, %v1173_v12 }
 0x15c   : > { %2291 = vmatmul.msk.bf16.gmra.mxu2 %vm322_vm1, %v1346_v19  ;;  %2330 = vmatmul.msk.bf16.gmra.mxu3 %vm322_vm1, %v1519_v25  ;;  %v3114_v1 = vadd.f32 %v1088_v44, %v961_v23  ;;  %v274_v23 = vld [vmem:[#allocation2 + $0xa8] sm:$0xff] }
 0x15d   : > { %2369 = vmatmul.msk.bf16.gmra.mxu0 %vm322_vm1, %v1692_v28 }
 0x15f   : > { %v748_v4 = vpop.f32.mrf.mxu2  ;;  %v920_v31 = vpop.f32.mrf.mxu3 }
 0x160   : > { %v790_v32 = vadd.f32 %v748_v4, %v617_v27  ;;  %v577_v37 = vpop.f32.mrf.mxu1 }
 0x161   : > { %v618_v38 = vadd.f32 %v577_v37, %v445_v3  ;;  %v2272_v3 = vld [vmem:[%s3056_s14 + $0xa4] sm:$0xff]  ;;  %v2312_v37 = vld [vmem:[%s3059_s28 + $0xac] sm:$0xff] }
 0x162   : > { %v962_v39 = vadd.f32 %v920_v31, %v790_v32  ;;  %v1093_v45 = vpop.f32.mrf.mxu0  ;;  %v2273_v31 = vld [vmem:[%s3056_s14 + $0xac] sm:$0xff]  ;;  %v2311_v32 = vld [vmem:[%s3059_s28 + $0xa4] sm:$0xff] }
 0x163   : > { %v1348_v51 = vpack.c.bf16 %v2273_v31, %v2272_v3  ;;  %v1521_v52 = vpack.c.bf16 %v2312_v37, %v2311_v32 }
 0x164   : > { %v3121_v50 = vadd.f32 %v1091_v29, %v962_v39  ;;  %v2233_v29 = vld [vmem:[%s3053_s6 + $0xa4] sm:$0xff]  ;;  %v448_v39 = vadd.f32 %v2964_v41, %v274_v23 }
 0x165   : > { %v1175_v47 = vpack.c.bf16 %v2234_v30, %v2233_v29 }
 0x167   : > { %v750_v44 = vpop.f32.mrf.mxu2  ;;  %v922_v59 = vpop.f32.mrf.mxu3 }
 0x168   : > { %v791_v62 = vadd.f32 %v750_v44, %v618_v38  ;;  %v580_v63 = vpop.f32.mrf.mxu1  ;;  %v2350_v38 = vld [vmem:[%s3062_s15 + $0xa4] sm:$0xff] }
 0x169   : > { %v619_v8 = vadd.f32 %v580_v63, %v446_v58  ;;  %v1694_v57 = vpack.c.bf16 %v2351_v33, %v2350_v38  ;;  %v275_v44 = vld [vmem:[#allocation2 + $0x68] sm:$0xff] }
 0x16a   : > { %v963_v43 = vadd.f32 %v922_v59, %v791_v62  ;;  %v1096_v10 = vpop.f32.mrf.mxu0  ;;  %v449_v59 = vadd.f32 %v2981_v55, %v275_v44  ;;  %v2353_v55 = vld [vmem:[%s3062_s15 + $0xbc] sm:$0xff]  ;;  %v2238_v44 = vld [vmem:[%s3053_s6 + $0xcc] sm:$0xff] }
 0x16b   : > { %2253 = vmatmul.msk.bf16.gmra.mxu1 %vm322_vm1, %v1174_v61 }
 0x16c   : > { %2292 = vmatmul.msk.bf16.gmra.mxu2 %vm322_vm1, %v1347_v6  ;;  %2331 = vmatmul.msk.bf16.gmra.mxu3 %vm322_vm1, %v1520_v0  ;;  %v3132_v21 = vadd.f32 %v1093_v45, %v963_v43  ;;  %v276_v43 = vld [vmem:[#allocation2 + $0x30] sm:$0xff] }
 0x16d   : > { %2370 = vmatmul.msk.bf16.gmra.mxu0 %vm322_vm1, %v1693_v9 }
 0x16f   : > { %v753_v12 = vpop.f32.mrf.mxu2  ;;  %v925_v60 = vpop.f32.mrf.mxu3 }
 0x170   : > { %v792_v17 = vadd.f32 %v753_v12, %v619_v8  ;;  %v582_v19 = vpop.f32.mrf.mxu1 }
 0x171   : > { %v620_v25 = vadd.f32 %v582_v19, %v447_v24  ;;  %v2274_v24 = vld [vmem:[%s3056_s14 + $0xb4] sm:$0xff]  ;;  %v2314_v19 = vld [vmem:[%s3059_s28 + $0xbc] sm:$0xff] }
 0x172   : > { %v964_v27 = vadd.f32 %v925_v60, %v792_v17  ;;  %v1098_v28 = vpop.f32.mrf.mxu0  ;;  %v2275_v60 = vld [vmem:[%s3056_s14 + $0xbc] sm:$0xff]  ;;  %v2313_v17 = vld [vmem:[%s3059_s28 + $0xb4] sm:$0xff] }
 0x173   : > { %v1349_v31 = vpack.c.bf16 %v2275_v60, %v2274_v24  ;;  %v1522_v32 = vpack.c.bf16 %v2314_v19, %v2313_v17 }
 0x174   : > { %v3139_v4 = vadd.f32 %v1096_v10, %v964_v27  ;;  %v2235_v10 = vld [vmem:[%s3053_s6 + $0xb4] sm:$0xff]  ;;  %v450_v27 = vadd.f32 %v2910_v2, %v276_v43 }
 0x175   : > { %v1176_v29 = vpack.c.bf16 %v2236_v11, %v2235_v10 }
 0x177   : > { %v755_v45 = vpop.f32.mrf.mxu2  ;;  %v927_v46 = vpop.f32.mrf.mxu3 }
 0x178   : > { %v793_v48 = vadd.f32 %v755_v45, %v620_v25  ;;  %v585_v49 = vpop.f32.mrf.mxu1  ;;  %v2352_v25 = vld [vmem:[%s3062_s15 + $0xb4] sm:$0xff] }
 0x179   : > { %v621_v54 = vadd.f32 %v585_v49, %v448_v39  ;;  %v1695_v38 = vpack.c.bf16 %v2353_v55, %v2352_v25  ;;  %v277_v45 = vld [vmem:[#allocation2 + $0x58] sm:$0xff] }
 0x17a   : > { %v965_v13 = vadd.f32 %v927_v46, %v793_v48  ;;  %v1101_v58 = vpop.f32.mrf.mxu0  ;;  %v451_v46 = vadd.f32 %v2926_v14, %v277_v45  ;;  %v2355_v14 = vld [vmem:[%s3062_s15 + $0xcc] sm:$0xff]  ;;  %v2240_v45 = vld [vmem:[%s3053_s6 + $0xdc] sm:$0xff] }
 0x17b   : > { %2254 = vmatmul.msk.bf16.gmra.mxu1 %vm322_vm1, %v1175_v47 }
 0x17c   : > { %2293 = vmatmul.msk.bf16.gmra.mxu2 %vm322_vm1, %v1348_v51  ;;  %2332 = vmatmul.msk.bf16.gmra.mxu3 %vm322_vm1, %v1521_v52  ;;  %v3150_v41 = vadd.f32 %v1098_v28, %v965_v13  ;;  %v278_v13 = vld [vmem:[#allocation2 + $0x80] sm:$0xff] }
 0x17d   : > { %2371 = vmatmul.msk.bf16.gmra.mxu0 %vm322_vm1, %v1694_v57 }
 0x17f   : > { %v758_v61 = vpop.f32.mrf.mxu2  ;;  %v930_v62 = vpop.f32.mrf.mxu3 }
 0x180   : > { %v794_v63 = vadd.f32 %v758_v61, %v621_v54  ;;  %v587_v6 = vpop.f32.mrf.mxu1 }
 0x181   : > { %v622_v0 = vadd.f32 %v587_v6, %v449_v59  ;;  %v2276_v59 = vld [vmem:[%s3056_s14 + $0xc4] sm:$0xff]  ;;  %v2316_v6 = vld [vmem:[%s3059_s28 + $0xcc] sm:$0xff] }
 0x182   : > { %v966_v8 = vadd.f32 %v930_v62, %v794_v63  ;;  %v1103_v9 = vpop.f32.mrf.mxu0  ;;  %v2277_v62 = vld [vmem:[%s3056_s14 + $0xcc] sm:$0xff]  ;;  %v2315_v63 = vld [vmem:[%s3059_s28 + $0xc4] sm:$0xff] }
 0x183   : > { %v1350_v60 = vpack.c.bf16 %v2277_v62, %v2276_v59  ;;  %v1523_v17 = vpack.c.bf16 %v2316_v6, %v2315_v63 }
 0x184   : > { %v3157_v12 = vadd.f32 %v1101_v58, %v966_v8  ;;  %v2237_v58 = vld [vmem:[%s3053_s6 + $0xc4] sm:$0xff]  ;;  %v452_v8 = vadd.f32 %v2938_v22, %v278_v13 }
 0x185   : > { %v1177_v10 = vpack.c.bf16 %v2238_v44, %v2237_v58 }
 0x187   : > { %v760_v28 = vpop.f32.mrf.mxu2  ;;  %v932_v23 = vpop.f32.mrf.mxu3 }
 0x188   : > { %v795_v30 = vadd.f32 %v760_v28, %v622_v0  ;;  %v590_v3 = vpop.f32.mrf.mxu1  ;;  %v2354_v0 = vld [vmem:[%s3062_s15 + $0xc4] sm:$0xff]  ;;  %v279_v28 = vld [vmem:[#allocation2 + $0xb8] sm:$0xff] }
 0x189   : > { %v623_v37 = vadd.f32 %v590_v3, %v450_v27  ;;  %v1696_v25 = vpack.c.bf16 %v2355_v14, %v2354_v0 }
 0x18a   : > { %v967_v33 = vadd.f32 %v932_v23, %v795_v30  ;;  %v1106_v39 = vpop.f32.mrf.mxu0  ;;  %v453_v23 = vadd.f32 %v2954_v34, %v279_v28  ;;  %v2357_v34 = vld [vmem:[%s3062_s15 + $0xdc] sm:$0xff]  ;;  %v2280_v28 = vld [vmem:[%s3056_s14 + $0xe4] sm:$0xff] }
 0x18b   : > { %2255 = vmatmul.msk.bf16.gmra.mxu1 %vm322_vm1, %v1176_v29 }
 0x18c   : > { %2294 = vmatmul.msk.bf16.gmra.mxu2 %vm322_vm1, %v1349_v31  ;;  %2333 = vmatmul.msk.bf16.gmra.mxu3 %vm322_vm1, %v1522_v32  ;;  %v3168_v2 = vadd.f32 %v1103_v9, %v967_v33  ;;  %v280_v33 = vld [vmem:[#allocation2 + $0x20] sm:$0xff] }
 0x18d   : > { %2372 = vmatmul.msk.bf16.gmra.mxu0 %vm322_vm1, %v1695_v38 }
 0x18f   : > { %v763_v47 = vpop.f32.mrf.mxu2  ;;  %v935_v48 = vpop.f32.mrf.mxu3 }
 0x190   : > { %v796_v49 = vadd.f32 %v763_v47, %v623_v37  ;;  %v592_v51 = vpop.f32.mrf.mxu1 }
 0x191   : > { %v624_v52 = vadd.f32 %v592_v51, %v451_v46  ;;  %v2278_v46 = vld [vmem:[%s3056_s14 + $0xd4] sm:$0xff]  ;;  %v2318_v51 = vld [vmem:[%s3059_s28 + $0xdc] sm:$0xff] }
 0x192   : > { %v968_v54 = vadd.f32 %v935_v48, %v796_v49  ;;  %v1108_v57 = vpop.f32.mrf.mxu0  ;;  %v2279_v48 = vld [vmem:[%s3056_s14 + $0xdc] sm:$0xff]  ;;  %v2317_v49 = vld [vmem:[%s3059_s28 + $0xd4] sm:$0xff] }
 0x193   : > { %v1351_v62 = vpack.c.bf16 %v2279_v48, %v2278_v46  ;;  %v1524_v63 = vpack.c.bf16 %v2318_v51, %v2317_v49 }
 0x194   : > { %v3175_v61 = vadd.f32 %v1106_v39, %v968_v54  ;;  %v2239_v39 = vld [vmem:[%s3053_s6 + $0xd4] sm:$0xff]  ;;  %v454_v54 = vadd.f32 %v2966_v42, %v280_v33 }
 0x195   : > { %v1178_v58 = vpack.c.bf16 %v2240_v45, %v2239_v39 }
 0x197   : > { %v765_v9 = vpop.f32.mrf.mxu2  ;;  %v937_v43 = vpop.f32.mrf.mxu3 }
 0x198   : > { %v797_v11 = vadd.f32 %v765_v9, %v624_v52  ;;  %v595_v24 = vpop.f32.mrf.mxu1  ;;  %v2356_v52 = vld [vmem:[%s3062_s15 + $0xd4] sm:$0xff]  ;;  %v281_v9 = vld [vmem:[#allocation2 + $0x8] sm:$0xff] }
 0x199   : > { %v625_v19 = vadd.f32 %v595_v24, %v452_v8  ;;  %v1697_v0 = vpack.c.bf16 %v2357_v34, %v2356_v52 }
 0x19a   : > { %v969_v55 = vadd.f32 %v937_v43, %v797_v11  ;;  %v1111_v27 = vpop.f32.mrf.mxu0  ;;  %v455_v43 = vadd.f32 %v2983_v56, %v281_v9  ;;  %v2322_v9 = vld [vmem:[%s3059_s28 + $0xfc] sm:$0xff] }
 0x19b   : > { %2256 = vmatmul.msk.bf16.gmra.mxu1 %vm322_vm1, %v1177_v10 }
 0x19c   : > { %2295 = vmatmul.msk.bf16.gmra.mxu2 %vm322_vm1, %v1350_v60  ;;  %2334 = vmatmul.msk.bf16.gmra.mxu3 %vm322_vm1, %v1523_v17  ;;  %v3186_v22 = vadd.f32 %v1108_v57, %v969_v55  ;;  %v2241_v55 = vld [vmem:[%s3053_s6 + $0xe4] sm:$0xff] }
 0x19d   : > { %2373 = vmatmul.msk.bf16.gmra.mxu0 %vm322_vm1, %v1696_v25 }
 0x19f   : > { %v768_v29 = vpop.f32.mrf.mxu2  ;;  %v940_v30 = vpop.f32.mrf.mxu3 }
 0x1a0   : > { %v798_v3 = vadd.f32 %v768_v29, %v625_v19  ;;  %v597_v31 = vpop.f32.mrf.mxu1  ;;  %v2281_v29 = vld [vmem:[%s3056_s14 + $0xec] sm:$0xff] }
 0x1a1   : > { %v626_v32 = vadd.f32 %v597_v31, %v453_v23  ;;  %v2358_v31 = vld [vmem:[%s3062_s15 + $0xe4] sm:$0xff]  ;;  %v1352_v45 = vpack.c.bf16 %v2281_v29, %v2280_v28 }
 0x1a2   : > { %v970_v37 = vadd.f32 %v940_v30, %v798_v3  ;;  %v1113_v38 = vpop.f32.mrf.mxu0  ;;  %v2319_v30 = vld [vmem:[%s3059_s28 + $0xe4] sm:$0xff]  ;;  %v2320_v3 = vld [vmem:[%s3059_s28 + $0xec] sm:$0xff] }
 0x1a3   : > { %v1525_v46 = vpack.c.bf16 %v2320_v3, %v2319_v30 }
 0x1a4   : > { %v3193_v47 = vadd.f32 %v1111_v27, %v970_v37  ;;  %v2242_v27 = vld [vmem:[%s3053_s6 + $0xec] sm:$0xff] }
 0x1a7   : > { %v770_v57 = vpop.f32.mrf.mxu2  ;;  %v942_v13 = vpop.f32.mrf.mxu3 }
 0x1a8   : > { %v799_v44 = vadd.f32 %v770_v57, %v626_v32  ;;  %v600_v59 = vpop.f32.mrf.mxu1  ;;  %v2359_v32 = vld [vmem:[%s3062_s15 + $0xec] sm:$0xff] }
 0x1a9   : > { %v627_v6 = vadd.f32 %v600_v59, %v454_v54  ;;  %v1698_v48 = vpack.c.bf16 %v2359_v32, %v2358_v31 }
 0x1aa   : > { %v971_v14 = vadd.f32 %v942_v13, %v799_v44  ;;  %v1116_v8 = vpop.f32.mrf.mxu0 }
 0x1ab   : > { %2257 = vmatmul.msk.bf16.gmra.mxu1 %vm322_vm1, %v1178_v58 }
 0x1ac   : > { %2296 = vmatmul.msk.bf16.gmra.mxu2 %vm322_vm1, %v1351_v62  ;;  %2335 = vmatmul.msk.bf16.gmra.mxu3 %vm322_vm1, %v1524_v63  ;;  %v3204_v42 = vadd.f32 %v1113_v38, %v971_v14  ;;  %v1179_v38 = vpack.c.bf16 %v2242_v27, %v2241_v55  ;;  %v2243_v63 = vld [vmem:[%s3053_s6 + $0xf4] sm:$0xff]  ;;  %v2283_v14 = vld [vmem:[%s3056_s14 + $0xfc] sm:$0xff] }
 0x1ad   : > { %2374 = vmatmul.msk.bf16.gmra.mxu0 %vm322_vm1, %v1697_v0  ;;  %v2282_v0 = vld [vmem:[%s3056_s14 + $0xf4] sm:$0xff] }
 0x1af   : > { %v773_v10 = vpop.f32.mrf.mxu2  ;;  %v945_v11 = vpop.f32.mrf.mxu3 }
 0x1b0   : > { %v800_v24 = vadd.f32 %v773_v10, %v627_v6  ;;  %v602_v60 = vpop.f32.mrf.mxu1  ;;  %v2244_v6 = vld [vmem:[%s3053_s6 + $0xfc] sm:$0xff] }
 0x1b1   : > { %v628_v17 = vadd.f32 %v602_v60, %v455_v43  ;;  %v2360_v43 = vld [vmem:[%s3062_s15 + $0xf4] sm:$0xff]  ;;  %v2361_v10 = vld [vmem:[%s3062_s15 + $0xfc] sm:$0xff]  ;;  %v1180_v60 = vpack.c.bf16 %v2244_v6, %v2243_v63 }
 0x1b2   : > { %v972_v19 = vadd.f32 %v945_v11, %v800_v24  ;;  %v1118_v25 = vpop.f32.mrf.mxu0  ;;  %v1699_v27 = vpack.c.bf16 %v2361_v10, %v2360_v43 }
 0x1b4   : > { %v3211_v23 = vadd.f32 %v1116_v8, %v972_v19  ;;  %v2321_v8 = vld [vmem:[%s3059_s28 + $0xf4] sm:$0xff] }
 0x1b5   : > { %v1526_v55 = vpack.c.bf16 %v2322_v9, %v2321_v8 }
 0x1b7   : > { %v775_v37 = vpop.f32.mrf.mxu2  ;;  %v947_v56 = vpop.f32.mrf.mxu3 }
 0x1b8   : > { %v801_v33 = vadd.f32 %v775_v37, %v628_v17  ;;  %v1233_v39 = vpop.f32.mrf.mxu1 }
 0x1b9   : > { %v1293_v34 = vadd.f32 %v1233_v39, %v2993_v26  ;;  %v2245_v39 = vld [vmem:[%s3053_s6 + $0x104] sm:$0xff] }
 0x1ba   : > { %v973_v49 = vadd.f32 %v947_v56, %v801_v33  ;;  %v1752_v51 = vpop.f32.mrf.mxu0 }
 0x1bb   : > { %2258 = vmatmul.msk.bf16.gmra.mxu1 %vm322_vm1, %v1179_v38 }
 0x1bc   : > { %2297 = vmatmul.msk.bf16.gmra.mxu2 %vm322_vm1, %v1352_v45  ;;  %2336 = vmatmul.msk.bf16.gmra.mxu3 %vm322_vm1, %v1525_v46  ;;  %v3221_v52 = vadd.f32 %v1118_v25, %v973_v49  ;;  %v1353_v25 = vpack.c.bf16 %v2283_v14, %v2282_v0  ;;  %v2246_v45 = vld [vmem:[%s3053_s6 + $0x10c] sm:$0xff]  ;;  %v2284_v46 = vld [vmem:[%s3056_s14 + $0x104] sm:$0xff] }
 0x1bd   : > { %2375 = vmatmul.msk.bf16.gmra.mxu0 %vm322_vm1, %v1698_v48  ;;  %v2285_v48 = vld [vmem:[%s3056_s14 + $0x10c] sm:$0xff]  ;;  %v2323_v49 = vld [vmem:[%s3059_s28 + $0x104] sm:$0xff] }
 0x1be   : > { %v1354_v63 = vpack.c.bf16 %v2285_v48, %v2284_v46 }
 0x1bf   : > { %v1406_v54 = vpop.f32.mrf.mxu2  ;;  %v1579_v57 = vpop.f32.mrf.mxu3 }
 0x1c0   : > { %v1466_v13 = vadd.f32 %v1406_v54, %v1293_v34  ;;  %v1235_v58 = vpop.f32.mrf.mxu1  ;;  %v2362_v34 = vld [vmem:[%s3062_s15 + $0x104] sm:$0xff]  ;;  %v2363_v54 = vld [vmem:[%s3062_s15 + $0x10c] sm:$0xff] }
 0x1c1   : > { %v1294_v26 = vadd.f32 %v1235_v58, %v3004_v20  ;;  %v1181_v58 = vpack.c.bf16 %v2246_v45, %v2245_v39  ;;  %v1700_v0 = vpack.c.bf16 %v2363_v54, %v2362_v34 }
 0x1c2   : > { %v1639_v44 = vadd.f32 %v1579_v57, %v1466_v13  ;;  %v1754_v59 = vpop.f32.mrf.mxu0 }
 0x1c4   : > { %v3225_v62 = vadd.f32 %v1752_v51, %v1639_v44  ;;  %v2324_v51 = vld [vmem:[%s3059_s28 + $0x10c] sm:$0xff] }
 0x1c5   : > { %v1527_v6 = vpack.c.bf16 %v2324_v51, %v2323_v49 }
 0x1c6   : > { %1836 = vst [vmem:[#allocation2 + $0xb0] sm:$0xff] %v3225_v62 }
 0x1c7   : > { %v1408_v11 = vpop.f32.mrf.mxu2  ;;  %v1581_v24 = vpop.f32.mrf.mxu3 }
 0x1c8   : > { %v1467_v17 = vadd.f32 %v1408_v11, %v1294_v26  ;;  %v1238_v19 = vpop.f32.mrf.mxu1 }
 0x1c9   : > { %v1295_v20 = vadd.f32 %v1238_v19, %v3011_v7  ;;  %v2247_v19 = vld [vmem:[%s3053_s6 + $0x114] sm:$0xff] }
 0x1ca   : > { %v1640_v28 = vadd.f32 %v1581_v24, %v1467_v17  ;;  %v1757_v29 = vpop.f32.mrf.mxu0 }
 0x1cb   : > { %2259 = vmatmul.msk.bf16.gmra.mxu1 %vm322_vm1, %v1180_v60 }
 0x1cc   : > { %v3238_v30 = vadd.f32 %v1754_v59, %v1640_v28  ;;  %2298 = vmatmul.msk.bf16.gmra.mxu2 %vm322_vm1, %v1353_v25  ;;  %2337 = vmatmul.msk.bf16.gmra.mxu3 %vm322_vm1, %v1526_v55  ;;  %v2248_v25 = vld [vmem:[%s3053_s6 + $0x11c] sm:$0xff]  ;;  %v2286_v55 = vld [vmem:[%s3056_s14 + $0x114] sm:$0xff] }
 0x1cd   : > { %2376 = vmatmul.msk.bf16.gmra.mxu0 %vm322_vm1, %v1699_v27  ;;  %v2287_v27 = vld [vmem:[%s3056_s14 + $0x11c] sm:$0xff]  ;;  %v2325_v28 = vld [vmem:[%s3059_s28 + $0x114] sm:$0xff] }
 0x1ce   : > { %1837 = vst [vmem:[#allocation2] sm:$0xff] %v3238_v30  ;;  %v1355_v39 = vpack.c.bf16 %v2287_v27, %v2286_v55 }
 0x1cf   : > { %v1411_v3 = vpop.f32.mrf.mxu2  ;;  %v1584_v31 = vpop.f32.mrf.mxu3 }
 0x1d0   : > { %v1468_v32 = vadd.f32 %v1411_v3, %v1295_v20  ;;  %v1240_v37 = vpop.f32.mrf.mxu1  ;;  %v2364_v20 = vld [vmem:[%s3062_s15 + $0x114] sm:$0xff]  ;;  %v2365_v3 = vld [vmem:[%s3062_s15 + $0x11c] sm:$0xff] }
 0x1d1   : > { %v1296_v7 = vadd.f32 %v1240_v37, %v3022_v40  ;;  %v1182_v37 = vpack.c.bf16 %v2248_v25, %v2247_v19  ;;  %v1701_v46 = vpack.c.bf16 %v2365_v3, %v2364_v20 }
 0x1d2   : > { %v1641_v56 = vadd.f32 %v1584_v31, %v1468_v32  ;;  %v1759_v38 = vpop.f32.mrf.mxu0 }
 0x1d4   : > { %v3245_v33 = vadd.f32 %v1757_v29, %v1641_v56  ;;  %v2326_v29 = vld [vmem:[%s3059_s28 + $0x11c] sm:$0xff] }
 0x1d5   : > { %v1528_v45 = vpack.c.bf16 %v2326_v29, %v2325_v28 }
 0x1d6   : > { %1838 = vst [vmem:[#allocation2 + $0x10] sm:$0xff] %v3245_v33 }
 0x1d7   : > { %v1413_v57 = vpop.f32.mrf.mxu2  ;;  %v1586_v13 = vpop.f32.mrf.mxu3 }
 0x1d8   : > { %v1469_v44 = vadd.f32 %v1413_v57, %v1296_v7  ;;  %v1243_v59 = vpop.f32.mrf.mxu1 }
 0x1d9   : > { %v1297_v40 = vadd.f32 %v1243_v59, %v3029_v53 }
 0x1da   : > { %v1642_v14 = vadd.f32 %v1586_v13, %v1469_v44  ;;  %v1762_v8 = vpop.f32.mrf.mxu0 }
 0x1db   : > { %2260 = vmatmul.msk.bf16.gmra.mxu1 %vm322_vm1, %v1181_v58 }
 0x1dc   : > { %v3258_v9 = vadd.f32 %v1759_v38, %v1642_v14  ;;  %2299 = vmatmul.msk.bf16.gmra.mxu2 %vm322_vm1, %v1354_v63  ;;  %2338 = vmatmul.msk.bf16.gmra.mxu3 %vm322_vm1, %v1527_v6 }
 0x1dd   : > { %2377 = vmatmul.msk.bf16.gmra.mxu0 %vm322_vm1, %v1700_v0 }
 0x1de   : > { %1839 = vst [vmem:[#allocation2 + $0x48] sm:$0xff] %v3258_v9 }
 0x1df   : > { %v1416_v26 = vpop.f32.mrf.mxu2  ;;  %v1589_v43 = vpop.f32.mrf.mxu3 }
 0x1e0   : > { %v1470_v10 = vadd.f32 %v1416_v26, %v1297_v40  ;;  %v1245_v11 = vpop.f32.mrf.mxu1 }
 0x1e1   : > { %v1298_v53 = vadd.f32 %v1245_v11, %v3043_v15 }
 0x1e2   : > { %v1643_v24 = vadd.f32 %v1589_v43, %v1470_v10  ;;  %v1764_v60 = vpop.f32.mrf.mxu0 }
 0x1e4   : > { %v3265_v17 = vadd.f32 %v1762_v8, %v1643_v24 }
 0x1e6   : > { %1840 = vst [vmem:[#allocation2 + $0x60] sm:$0xff] %v3265_v17 }
 0x1e7   : > { %v1418_v31 = vpop.f32.mrf.mxu2  ;;  %v1591_v32 = vpop.f32.mrf.mxu3 }
 0x1e8   : > { %v1471_v56 = vadd.f32 %v1418_v31, %v1298_v53  ;;  %v1248_v38 = vpop.f32.mrf.mxu1 }
 0x1e9   : > { %v1299_v15 = vadd.f32 %v1248_v38, %v3067_v35 }
 0x1ea   : > { %v1644_v48 = vadd.f32 %v1591_v32, %v1471_v56  ;;  %v1767_v49 = vpop.f32.mrf.mxu0 }
 0x1eb   : > { %2261 = vmatmul.msk.bf16.gmra.mxu1 %vm322_vm1, %v1182_v37 }
 0x1ec   : > { %v3278_v51 = vadd.f32 %v1764_v60, %v1644_v48  ;;  %2300 = vmatmul.msk.bf16.gmra.mxu2 %vm322_vm1, %v1355_v39  ;;  %2339 = vmatmul.msk.bf16.gmra.mxu3 %vm322_vm1, %v1528_v45 }
 0x1ed   : > { %2378 = vmatmul.msk.bf16.gmra.mxu0 %vm322_vm1, %v1701_v46 }
 0x1ee   : > { %1841 = vst [vmem:[#allocation2 + $0x28] sm:$0xff] %v3278_v51 }
 0x1ef   : > { %v1421_v7 = vpop.f32.mrf.mxu2  ;;  %v1594_v34 = vpop.f32.mrf.mxu3 }
 0x1f0   : > { %v1472_v54 = vadd.f32 %v1421_v7, %v1299_v15  ;;  %v1250_v57 = vpop.f32.mrf.mxu1 }
 0x1f1   : > { %v1300_v59 = vadd.f32 %v1250_v57, %v3078_v16 }
 0x1f2   : > { %v1645_v13 = vadd.f32 %v1594_v34, %v1472_v54  ;;  %v1769_v58 = vpop.f32.mrf.mxu0 }
 0x1f4   : > { %v3285_v44 = vadd.f32 %v1767_v49, %v1645_v13 }
 0x1f6   : > { %1842 = vst [vmem:[#allocation2 + $0x40] sm:$0xff] %v3285_v44 }
 0x1f7   : > { %v1423_v63 = vpop.f32.mrf.mxu2  ;;  %v1596_v6 = vpop.f32.mrf.mxu3 }
 0x1f8   : > { %v1473_v0 = vadd.f32 %v1423_v63, %v1300_v59  ;;  %v1253_v14 = vpop.f32.mrf.mxu1 }
 0x1f9   : > { %v1301_v35 = vadd.f32 %v1253_v14, %v3085_v18 }
 0x1fa   : > { %v1646_v8 = vadd.f32 %v1596_v6, %v1473_v0  ;;  %v1772_v40 = vpop.f32.mrf.mxu0 }
 0x1fc   : > { %v3289_v26 = vadd.f32 %v1769_v58, %v1646_v8 }
 0x1fe   : > { %1843 = vst [vmem:[#allocation2 + $0x78] sm:$0xff] %v3289_v26 }
 0x1ff   : > { %v1426_v43 = vpop.f32.mrf.mxu2  ;;  %v1599_v10 = vpop.f32.mrf.mxu3 }
 0x200   : > { %v1474_v11 = vadd.f32 %v1426_v43, %v1301_v35  ;;  %v1255_v24 = vpop.f32.mrf.mxu1 }
 0x201   : > { %v1302_v16 = vadd.f32 %v1255_v24, %v3096_v36 }
 0x202   : > { %v1647_v60 = vadd.f32 %v1599_v10, %v1474_v11  ;;  %v1774_v19 = vpop.f32.mrf.mxu0 }
 0x204   : > { %v3293_v25 = vadd.f32 %v1772_v40, %v1647_v60 }
 0x206   : > { %1844 = vst [vmem:[#allocation2 + $0x88] sm:$0xff] %v3293_v25 }
 0x207   : > { %v1428_v55 = vpop.f32.mrf.mxu2  ;;  %v1601_v27 = vpop.f32.mrf.mxu3 }
 0x208   : > { %v1475_v28 = vadd.f32 %v1428_v55, %v1302_v16  ;;  %v1258_v29 = vpop.f32.mrf.mxu1 }
 0x209   : > { %v1303_v18 = vadd.f32 %v1258_v29, %v3103_v5 }
 0x20a   : > { %v1648_v53 = vadd.f32 %v1601_v27, %v1475_v28  ;;  %v1777_v20 = vpop.f32.mrf.mxu0 }
 0x20c   : > { %v3297_v3 = vadd.f32 %v1774_v19, %v1648_v53 }
 0x20e   : > { %1845 = vst [vmem:[#allocation2 + $0x90] sm:$0xff] %v3297_v3 }
 0x20f   : > { %v1431_v31 = vpop.f32.mrf.mxu2  ;;  %v1604_v32 = vpop.f32.mrf.mxu3 }
 0x210   : > { %v1476_v37 = vadd.f32 %v1431_v31, %v1303_v18  ;;  %v1260_v56 = vpop.f32.mrf.mxu1 }
 0x211   : > { %v1304_v36 = vadd.f32 %v1260_v56, %v3114_v1 }
 0x212   : > { %v1649_v38 = vadd.f32 %v1604_v32, %v1476_v37  ;;  %v1779_v39 = vpop.f32.mrf.mxu0 }
 0x214   : > { %v3301_v45 = vadd.f32 %v1777_v20, %v1649_v38 }
 0x216   : > { %1846 = vst [vmem:[#allocation2 + $0x18] sm:$0xff] %v3301_v45 }
 0x217   : > { %v1433_v46 = vpop.f32.mrf.mxu2  ;;  %v1606_v48 = vpop.f32.mrf.mxu3 }
 0x218   : > { %v1477_v49 = vadd.f32 %v1433_v46, %v1304_v36  ;;  %v1263_v15 = vpop.f32.mrf.mxu1 }
 0x219   : > { %v1305_v5 = vadd.f32 %v1263_v15, %v3121_v50 }
 0x21a   : > { %v1650_v7 = vadd.f32 %v1606_v48, %v1477_v49  ;;  %v1782_v34 = vpop.f32.mrf.mxu0 }
 0x21c   : > { %v3305_v54 = vadd.f32 %v1779_v39, %v1650_v7 }
 0x21e   : > { %1847 = vst [vmem:[#allocation2 + $0x98] sm:$0xff] %v3305_v54 }
 0x21f   : > { %v1436_v57 = vpop.f32.mrf.mxu2  ;;  %v1609_v13 = vpop.f32.mrf.mxu3 }
 0x220   : > { %v1478_v58 = vadd.f32 %v1436_v57, %v1305_v5  ;;  %v1265_v59 = vpop.f32.mrf.mxu1 }
 0x221   : > { %v1306_v1 = vadd.f32 %v1265_v59, %v3132_v21 }
 0x222   : > { %v1651_v63 = vadd.f32 %v1609_v13, %v1478_v58  ;;  %v1784_v6 = vpop.f32.mrf.mxu0 }
 0x224   : > { %v3309_v0 = vadd.f32 %v1782_v34, %v1651_v63 }
 0x226   : > { %1848 = vst [vmem:[#allocation2 + $0x38] sm:$0xff] %v3309_v0 }
 0x227   : > { %v1438_v14 = vpop.f32.mrf.mxu2  ;;  %v1611_v8 = vpop.f32.mrf.mxu3 }
 0x228   : > { %v1479_v40 = vadd.f32 %v1438_v14, %v1306_v1  ;;  %v1268_v35 = vpop.f32.mrf.mxu1 }
 0x229   : > { %v1307_v50 = vadd.f32 %v1268_v35, %v3139_v4 }
 0x22a   : > { %v1652_v43 = vadd.f32 %v1611_v8, %v1479_v40  ;;  %v1787_v10 = vpop.f32.mrf.mxu0 }
 0x22c   : > { %v3313_v11 = vadd.f32 %v1784_v6, %v1652_v43 }
 0x22e   : > { %1849 = vst [vmem:[#allocation2 + $0x50] sm:$0xff] %v3313_v11 }
 0x22f   : > { %v1441_v24 = vpop.f32.mrf.mxu2  ;;  %v1614_v60 = vpop.f32.mrf.mxu3 }
 0x230   : > { %v1480_v19 = vadd.f32 %v1441_v24, %v1307_v50  ;;  %v1270_v16 = vpop.f32.mrf.mxu1 }
 0x231   : > { %v1308_v21 = vadd.f32 %v1270_v16, %v3150_v41 }
 0x232   : > { %v1653_v55 = vadd.f32 %v1614_v60, %v1480_v19  ;;  %v1789_v27 = vpop.f32.mrf.mxu0 }
 0x234   : > { %v3317_v28 = vadd.f32 %v1787_v10, %v1653_v55 }
 0x236   : > { %1850 = vst [vmem:[#allocation2 + $0x70] sm:$0xff] %v3317_v28 }
 0x237   : > { %v1443_v29 = vpop.f32.mrf.mxu2  ;;  %v1616_v53 = vpop.f32.mrf.mxu3 }
 0x238   : > { %v1481_v20 = vadd.f32 %v1443_v29, %v1308_v21  ;;  %v1273_v18 = vpop.f32.mrf.mxu1 }
 0x239   : > { %v1309_v4 = vadd.f32 %v1273_v18, %v3157_v12 }
 0x23a   : > { %v1654_v31 = vadd.f32 %v1616_v53, %v1481_v20  ;;  %v1792_v32 = vpop.f32.mrf.mxu0 }
 0x23c   : > { %v3321_v37 = vadd.f32 %v1789_v27, %v1654_v31 }
 0x23e   : > { %1851 = vst [vmem:[#allocation2 + $0xa0] sm:$0xff] %v3321_v37 }
 0x23f   : > { %v1446_v56 = vpop.f32.mrf.mxu2  ;;  %v1619_v38 = vpop.f32.mrf.mxu3 }
 0x240   : > { %v1482_v39 = vadd.f32 %v1446_v56, %v1309_v4  ;;  %v1275_v36 = vpop.f32.mrf.mxu1 }
 0x241   : > { %v1310_v41 = vadd.f32 %v1275_v36, %v3168_v2 }
 0x242   : > { %v1655_v46 = vadd.f32 %v1619_v38, %v1482_v39  ;;  %v1794_v48 = vpop.f32.mrf.mxu0 }
 0x244   : > { %v3325_v49 = vadd.f32 %v1792_v32, %v1655_v46 }
 0x246   : > { %1852 = vst [vmem:[#allocation2 + $0xa8] sm:$0xff] %v3325_v49 }
 0x247   : > { %v1448_v15 = vpop.f32.mrf.mxu2  ;;  %v1621_v7 = vpop.f32.mrf.mxu3 }
 0x248   : > { %v1483_v34 = vadd.f32 %v1448_v15, %v1310_v41  ;;  %v1278_v5 = vpop.f32.mrf.mxu1 }
 0x249   : > { %v1311_v12 = vadd.f32 %v1278_v5, %v3175_v61 }
 0x24a   : > { %v1656_v57 = vadd.f32 %v1621_v7, %v1483_v34  ;;  %v1797_v13 = vpop.f32.mrf.mxu0 }
 0x24c   : > { %v3329_v58 = vadd.f32 %v1794_v48, %v1656_v57 }
 0x24e   : > { %1853 = vst [vmem:[#allocation2 + $0x68] sm:$0xff] %v3329_v58 }
 0x24f   : > { %v1451_v59 = vpop.f32.mrf.mxu2  ;;  %v1624_v63 = vpop.f32.mrf.mxu3 }
 0x250   : > { %v1484_v6 = vadd.f32 %v1451_v59, %v1311_v12  ;;  %v1280_v1 = vpop.f32.mrf.mxu1 }
 0x251   : > { %v1312_v2 = vadd.f32 %v1280_v1, %v3186_v22 }
 0x252   : > { %v1657_v14 = vadd.f32 %v1624_v63, %v1484_v6  ;;  %v1799_v8 = vpop.f32.mrf.mxu0 }
 0x254   : > { %v3333_v40 = vadd.f32 %v1797_v13, %v1657_v14 }
 0x256   : > { %1854 = vst [vmem:[#allocation2 + $0x30] sm:$0xff] %v3333_v40 }
 0x257   : > { %v1453_v35 = vpop.f32.mrf.mxu2  ;;  %v1626_v43 = vpop.f32.mrf.mxu3 }
 0x258   : > { %v1485_v10 = vadd.f32 %v1453_v35, %v1312_v2  ;;  %v1283_v50 = vpop.f32.mrf.mxu1 }
 0x259   : > { %v1313_v61 = vadd.f32 %v1283_v50, %v3193_v47 }
 0x25a   : > { %v1658_v24 = vadd.f32 %v1626_v43, %v1485_v10  ;;  %v1802_v19 = vpop.f32.mrf.mxu0 }
 0x25c   : > { %v1831_v60 = vadd.f32 %v1799_v8, %v1658_v24 }
 0x25e   : > { %1855 = vst [vmem:[#allocation2 + $0x58] sm:$0xff] %v1831_v60 }
 0x25f   : > { %v1456_v16 = vpop.f32.mrf.mxu2  ;;  %v1629_v55 = vpop.f32.mrf.mxu3 }
 0x260   : > { %v1486_v27 = vadd.f32 %v1456_v16, %v1313_v61  ;;  %v1285_v21 = vpop.f32.mrf.mxu1 }
 0x261   : > { %v1314_v20 = vadd.f32 %v1285_v21, %v3204_v42 }
 0x262   : > { %v1659_v29 = vadd.f32 %v1629_v55, %v1486_v27  ;;  %v1804_v22 = vpop.f32.mrf.mxu0 }
 0x264   : > { %v1832_v53 = vadd.f32 %v1802_v19, %v1659_v29 }
 0x266   : > { %1856 = vst [vmem:[#allocation2 + $0x80] sm:$0xff] %v1832_v53 }
 0x267   : > { %v1458_v18 = vpop.f32.mrf.mxu2  ;;  %v1631_v31 = vpop.f32.mrf.mxu3 }
 0x268   : > { %v1487_v32 = vadd.f32 %v1458_v18, %v1314_v20  ;;  %v1288_v4 = vpop.f32.mrf.mxu1 }
 0x269   : > { %v1315_v39 = vadd.f32 %v1288_v4, %v3211_v23 }
 0x26a   : > { %v1660_v56 = vadd.f32 %v1631_v31, %v1487_v32  ;;  %v1807_v48 = vpop.f32.mrf.mxu0 }
 0x26c   : > { %v1833_v38 = vadd.f32 %v1804_v22, %v1660_v56 }
 0x26e   : > { %1857 = vst [vmem:[#allocation2 + $0xb8] sm:$0xff] %v1833_v38 }
 0x26f   : > { %v1461_v47 = vpop.f32.mrf.mxu2  ;;  %v1634_v36 = vpop.f32.mrf.mxu3 }
 0x270   : > { %v1488_v46 = vadd.f32 %v1461_v47, %v1315_v39  ;;  %v1290_v15 = vpop.f32.mrf.mxu1 }
 0x271   : > { %v1316_v42 = vadd.f32 %v1290_v15, %v3221_v52 }
 0x272   : > { %v1661_v41 = vadd.f32 %v1634_v36, %v1488_v46  ;;  %v1809_v12 = vpop.f32.mrf.mxu0 }
 0x274   : > { %v1834_v7 = vadd.f32 %v1807_v48, %v1661_v41 }
 0x276   : > { %1858 = vst [vmem:[#allocation2 + $0x20] sm:$0xff] %v1834_v7 }
 0x277   : > { %v1463_v34 = vpop.f32.mrf.mxu2  ;;  %v1636_v57 = vpop.f32.mrf.mxu3 }
 0x278   : > { %v1489_v5 = vadd.f32 %v1463_v34, %v1316_v42 }
 0x27a   : > { %v1662_v13 = vadd.f32 %v1636_v57, %v1489_v5  ;;  %1863 = sbr.rel (%p2379_p2) target bundleno = 663 (0x297), region = 40 }
 0x27c   : > { %v1835_v59 = vadd.f32 %v1809_v12, %v1662_v13 }
 0x27e   : > { %1859 = vst [vmem:[#allocation2 + $0x8] sm:$0xff] %v1835_v59 }
 0x27f   : > { %1864 = vst [vmem:[%s2744_s26] sm:$0xff] %v3225_v62 }
 0x280   : > { %1865 = vst [vmem:[%s2744_s26 + $0x8] sm:$0xff] %v3238_v30 }
 0x281   : > { %1866 = vst [vmem:[%s2744_s26 + $0x10] sm:$0xff] %v3245_v33 }
 0x282   : > { %1867 = vst [vmem:[%s2744_s26 + $0x18] sm:$0xff] %v3258_v9 }
 0x283   : > { %1868 = vst [vmem:[%s2744_s26 + $0x20] sm:$0xff] %v3265_v17 }
 0x284   : > { %1869 = vst [vmem:[%s2744_s26 + $0x28] sm:$0xff] %v3278_v51 }
 0x285   : > { %1870 = vst [vmem:[%s2744_s26 + $0x30] sm:$0xff] %v3285_v44 }
 0x286   : > { %1871 = vst [vmem:[%s2744_s26 + $0x38] sm:$0xff] %v3289_v26 }
 0x287   : > { %1872 = vst [vmem:[%s2744_s26 + $0x40] sm:$0xff] %v3293_v25 }
 0x288   : > { %1873 = vst [vmem:[%s2744_s26 + $0x48] sm:$0xff] %v3297_v3 }
 0x289   : > { %1874 = vst [vmem:[%s2744_s26 + $0x50] sm:$0xff] %v3301_v45 }
 0x28a   : > { %1875 = vst [vmem:[%s2744_s26 + $0x58] sm:$0xff] %v3305_v54 }
 0x28b   : > { %1876 = vst [vmem:[%s2744_s26 + $0x60] sm:$0xff] %v3309_v0 }
 0x28c   : > { %1877 = vst [vmem:[%s2744_s26 + $0x68] sm:$0xff] %v3313_v11 }
 0x28d   : > { %1878 = vst [vmem:[%s2744_s26 + $0x70] sm:$0xff] %v3317_v28 }
 0x28e   : > { %1879 = vst [vmem:[%s2744_s26 + $0x78] sm:$0xff] %v3321_v37 }
 0x28f   : > { %1880 = vst [vmem:[%s2744_s26 + $0x80] sm:$0xff] %v3325_v49 }
 0x290   : > { %1881 = vst [vmem:[%s2744_s26 + $0x88] sm:$0xff] %v3329_v58 }
 0x291   : > { %1882 = vst [vmem:[%s2744_s26 + $0x90] sm:$0xff] %v3333_v40 }
 0x292   : > { %1883 = vst [vmem:[%s2744_s26 + $0x98] sm:$0xff] %v1831_v60 }
 0x293   : > { %1884 = vst [vmem:[%s2744_s26 + $0xa0] sm:$0xff] %v1832_v53 }
 0x294   : > { %1885 = vst [vmem:[%s2744_s26 + $0xa8] sm:$0xff] %v1833_v38 }
 0x295   : > { %1886 = vst [vmem:[%s2744_s26 + $0xb0] sm:$0xff] %v1834_v7 }
 0x296   : > { %1887 = vst [vmem:[%s2744_s26 + $0xb8] sm:$0xff] %v1835_v59 }
 0x297 PF: > { %s1896_s22 = smul.u32 24, %s2585_s23  ;;  %s1903_s5 = sshll.u32 %s2744_s26, 4  ;;  %s1904_s5 = int_to_ptr.vmem [resolvable:$true] %s1903_s5 }
 0x298   : > { %s2389_s11 = smul.u32 48, %s2589_s24  ;;  %s3452_s12 = sand.u32 1, %s2573_s20  }
 0x299   : > { %s1889_s16 = scalar_lea.sflag [#allocation6], %s3452_s12  ;;  %s2513_s26 = scalar_lea.hbm %s3441_s4, 768 }
 0x29a   : > { %s1900_s18 = sadd.s32 %s2389_s11, %s1896_s22 }
 0x29b   : > { %s2380_s30 = sshll.u32 %s1900_s18, 3 }
 0x29c   : > { %s1902_s17 = scalar_lea.hbm %s3441_s4, %s2380_s30 }
 0x29d   : > { %s1905_s10 = sshll.u32 %s1902_s17, 4  ;;  %s1906_s10 = int_to_ptr.hbm [resolvable:$true] %s1905_s10 }
 0x29e   : > { %s2507_s6 = sshra.s32 %s1906_s10, 4  ;;  %s2508_s6 = int_to_ptr.hbm [resolvable:$true] %s2507_s6 }
 0x29f   : > { %s2509_s14 = scalar_lea.hbm %s2508_s6, 192  ;;  %p2514_p8 = scmp.lt.s32.totalorder %s2508_s6, %s3441_s4 }
 0x2a0   : > { %p2510_p3 = scmp.ne.s32.totalorder %s2508_s6, %s2509_s14  ;;  %p2515_p9 = scmp.lt.s32.totalorder %s2513_s26, %s2509_s14 }
 0x2a2   : > { %p2511_p4 = pnand %p2510_p3, %p2700_p6  ;;  %p2516_p10 = por %p2515_p9, %p2514_p8 }
 0x2a4   : > { %p2512_p5 = pneg %p2511_p4 }
 0x2a6   : > { %p2517_p11 = pnand %p2516_p10, %p2512_p5 }
 0x2a8   : > { %2520 = shalt.err (!%p2517_p11)
}
 0x2a9   : > { %s2608_s22 = smov 128   ;;  %s2609_s11 = smov 8  }
 0x2aa   : > { %2390 = dma.vmem_to_hbm [thread:$0]  (%p2700_p6), %s1904_s5, 3072, %s1906_s10, %s1889_s16, %s2608_s22, %s2608_s22, %s2609_s11  }
 0x2ab PF: > { %p2396_p12 = scmp.ge.s32.totalorder %s2605_s27, 2  ;;  %s1920_s18 = sand.u32 1, %s2569_s19  }
 0x2ac   : > { %s1921_s30 = scalar_lea.sflag [#allocation6], %s1920_s18 }
 0x2ad   : > { %p2393_p13 = pnand %p2396_p12, %p2707_p7 }
 0x2af   : > { %p2394_p0 = pneg %p2393_p13 }
 0x2b1   : > { %2564 = dma.done.wait (%p2394_p0), %s1921_s30, 3072  }
 0x2b2   : > { %2566 = vsyncadd (%p2394_p0), %s1921_s30, 4294964224  ;;  %s25_s27 = sadd.s32 1, %s2605_s27   ;;  %s3453_s24 = sld [smem:[#allocation9_spill]] }
 0x2b3   : > { %p22_p1 = scmp.ge.s32.totalorder %s25_s27, 14   ;;  %s3454_s7 = sld [smem:[#allocation10_spill]] }
 0x2b4   : > { %s3455_s5 = sld [smem:[#allocation11_spill]]  ;;  %s3457_s19 = smov %s2573_s20 }
 0x2b5   : > { %s3456_s26 = sld [smem:[#allocation12_spill]]  ;;  %s3458_s20 = smov %s2577_s21 }
 0x2b6   : > { %s3459_s21 = smov %s2721_s13  ;;  %s3460_s22 = smov %s2593_s0 }
 0x2b7   : > { %s3461_s23 = smov %s2597_s25  ;;  %24 = sbr.rel (!%p22_p1) target bundleno = 12 (0xc), region = 95 }
 0x2b9   : > { %s3462_s0 = smov %s3454_s7 }
 0x2ba   : > { %s3463_s25 = smov %s3455_s5 }
 0x2bc   :  { %1927 = vsyncpa [#allocation6], 1 }
 0x2bd   :  { %1929 = vsyncpa [#allocation6 + $0x1], 1 }

</bundles_post_ra>
